<compile_context>
chip_gen: v5e
topology: v5e:2x2
jax: 0.10.0
libtpu: 0.0.40
codegen_flags: <defaults>
</compile_context>

<pallas_src>
import jax
import jax.numpy as jnp
from jax import lax
from jax.experimental import pallas as pl
from jax.experimental.pallas import tpu as pltpu

DILATIONS = (1, 2, 4)
PAD = max(DILATIONS)          # one shared spatial padding for all branches
BN_EPS = 1e-5


# ------------------------------ host helpers --------------------------------

def _interp_matrix(n_out, n_in):
    """(n_out, n_in) bilinear interpolation matrix, align_corners=True."""
    pos = jnp.arange(n_out, dtype=jnp.float32) * (n_in - 1) / (n_out - 1)
    i0 = jnp.floor(pos).astype(jnp.int32)
    i1 = jnp.minimum(i0 + 1, n_in - 1)
    w = pos - i0.astype(jnp.float32)
    return (jax.nn.one_hot(i0, n_in, dtype=jnp.float32) * (1.0 - w)[:, None]
            + jax.nn.one_hot(i1, n_in, dtype=jnp.float32) * w[:, None])


def init_params(key, cl, ch):
    """Raw (PyTorch-layout) parameters of the FFM module (eval mode)."""
    ks = jax.random.split(key, 12)
    return {
        "wdw": jax.random.normal(ks[0], (3, cl, 1, 3, 3), jnp.float32) * 0.3,
        "dw_gamma": jax.random.uniform(ks[1], (3, cl), minval=0.5, maxval=1.5),
        "dw_beta": jax.random.normal(ks[2], (3, cl)) * 0.1,
        "dw_mean": jax.random.normal(ks[3], (3, cl)) * 0.1,
        "dw_var": jax.random.uniform(ks[4], (3, cl), minval=0.5, maxval=1.5),
        "w_aspp": jax.random.normal(ks[5], (ch, 4 * cl, 1, 1), jnp.float32) * 0.2,
        "b_aspp": jax.random.normal(ks[6], (ch,)) * 0.1,
        "w_out": jax.random.normal(ks[7], (cl, 2 * ch, 1, 1), jnp.float32) * 0.2,
        "out_gamma": jax.random.uniform(ks[8], (cl,), minval=0.5, maxval=1.5),
        "out_beta": jax.random.normal(ks[9], (cl,)) * 0.1,
        "out_mean": jax.random.normal(ks[10], (cl,)) * 0.1,
        "out_var": jax.random.uniform(ks[11], (cl,), minval=0.5, maxval=1.5),
    }


def fold_params(raw):
    """Kernel-layout params: depthwise BN scale folded into the weights,
    1x1 convs as (Cout, Cin) matrices, biases / BN terms as (C, 1) columns."""
    n_br, cl = raw["dw_gamma"].shape
    ch = raw["w_aspp"].shape[0]
    s_dw = raw["dw_gamma"] / jnp.sqrt(raw["dw_var"] + BN_EPS)          # (3, Cl)
    wdw = raw["wdw"][:, :, 0].reshape(n_br, cl, 9)                     # tap = ky*3+kx
    s_out = raw["out_gamma"] / jnp.sqrt(raw["out_var"] + BN_EPS)       # (Cl,)
    return {
        "wdw": (wdw * s_dw[:, :, None]).astype(jnp.float32),           # (3, Cl, 9)
        "bdw": (raw["dw_beta"] - raw["dw_mean"] * s_dw)[:, :, None],   # (3, Cl, 1)
        "w_aspp": raw["w_aspp"].reshape(ch, 4 * cl),                   # (Ch, 4Cl)
        "b_aspp": raw["b_aspp"][:, None],                              # (Ch, 1)
        "w_out": raw["w_out"].reshape(cl, 2 * ch),                     # (Cl, 2Ch)
        "s_out": s_out[:, None],                                       # (Cl, 1)
        "b_out": (raw["out_beta"] - raw["out_mean"] * s_out)[:, None], # (Cl, 1)
    }


# ---------------------------- fused Pallas kernel ----------------------------

def ffm_forward(low, high, p):
    """low: (N, Cl, H, W) f32, high: (N, Ch, Hh, Wh) f32  (NCHW, like PyTorch)."""
    N, Cl, H, W = low.shape
    _, Ch, Hh, Wh = high.shape
    Wp = W + 2 * PAD                      # padded row width
    LP = H * Wp                           # padded-flat compute-window length
    Sh = Hh * Wh
    HW = H * W

    # zero-padded, row-flattened low; lanes rounded up to a multiple of 128
    xp_min = 2 * PAD * (Wp + 1) + LP      # furthest tap-slice end
    XP = ((xp_min + 127) // 128) * 128
    xpad = jnp.pad(low, ((0, 0), (0, 0), (PAD, PAD), (PAD, PAD)))
    xpf = xpad.reshape(N, Cl, -1)
    xpf = jnp.pad(xpf, ((0, 0), (0, 0), (0, XP - xpf.shape[-1])))
    hif = high.reshape(N, Ch, Sh)

    # bilinear (align_corners=True) upsample as a matmul: rows = source pixels,
    # columns = padded-flat output positions (0 in the discarded gap columns).
    if Hh != H:                           # same condition as the PyTorch forward
        ty, tx = _interp_matrix(H, Hh), _interp_matrix(W, Wh)
    else:
        ty, tx = jnp.eye(H, dtype=jnp.float32), jnp.eye(W, dtype=jnp.float32)
    u = jnp.einsum("ia,jb->ijab", ty, tx).reshape(H, W, Sh)
    u = jnp.pad(u, ((0, 0), (0, Wp - W), (0, 0))).reshape(LP, Sh)
    ut = u.T                              # (Sh, LP)

    def kernel(xpf_ref, hi_ref, wdw_ref, bdw_ref, waspp_ref, baspp_ref,
               ut_ref, wout_ref, sout_ref, bout_ref, o_ref):
        xpf_b = xpf_ref[0]                                   # (Cl, XP)
        s0 = PAD * Wp + PAD
        low_pad = xpf_b[:, s0:s0 + LP]                       # low_level, padded-flat

        # depthwise dilated 3x3 branches (BN scale pre-folded into the weights)
        branches = [low_pad]
        for bidx, d in enumerate(DILATIONS):
            wb = wdw_ref[bidx]                               # (Cl, 9)
            acc = jnp.zeros((Cl, LP), jnp.float32)
            for ky in range(3):
                for kx in range(3):
                    s = (PAD + (ky - 1) * d) * Wp + PAD + (kx - 1) * d
                    t = ky * 3 + kx
                    acc = acc + xpf_b[:, s:s + LP] * wb[:, t:t + 1]
            branches.append(jnp.clip(acc + bdw_ref[bidx], 0.0, 6.0))

        # conv_aspp_out: concat over channels -> single K=4*Cl matmul (+bias, ReLU6)
        cat = jnp.concatenate(branches, axis=0)              # (4*Cl, LP)
        feat = jnp.clip(
            jnp.dot(waspp_ref[...], cat, preferred_element_type=jnp.float32)
            + baspp_ref[...], 0.0, 6.0)                      # (Ch, LP)

        # fused 2x bilinear upsample of `high` (one matmul, stays in VMEM)
        hi_up = jnp.dot(hi_ref[0], ut_ref[...],
                        preferred_element_type=jnp.float32)  # (Ch, LP)

        # conv_out: single K=2*Ch matmul + BN + ReLU6 + residual add
        cat2 = jnp.concatenate([feat, hi_up], axis=0)        # (2*Ch, LP)
        y = jnp.dot(wout_ref[...], cat2, preferred_element_type=jnp.float32)
        y = jnp.clip(y * sout_ref[...] + bout_ref[...], 0.0, 6.0) + low_pad

        # drop the Wp-row padding columns -> lane-dense (Cl, H*W) output block
        o_ref[0] = jnp.concatenate(
            [y[:, i * Wp:i * Wp + W] for i in range(H)], axis=1)

    out_flat = pl.pallas_call(
        kernel,
        out_shape=jax.ShapeDtypeStruct((N, Cl, HW), jnp.float32),
        grid=(N,),
        in_specs=[
            pl.BlockSpec((1, Cl, XP), lambda n: (n, 0, 0)),       # padded low
            pl.BlockSpec((1, Ch, Sh), lambda n: (n, 0, 0)),       # half-res high
            pl.BlockSpec((3, Cl, 9), lambda n: (0, 0, 0)),        # dw weights
            pl.BlockSpec((3, Cl, 1), lambda n: (0, 0, 0)),        # dw BN bias
            pl.BlockSpec((Ch, 4 * Cl), lambda n: (0, 0)),         # aspp 1x1 W
            pl.BlockSpec((Ch, 1), lambda n: (0, 0)),              # aspp bias
            pl.BlockSpec((Sh, LP), lambda n: (0, 0)),             # upsample matrix
            pl.BlockSpec((Cl, 2 * Ch), lambda n: (0, 0)),         # out 1x1 W
            pl.BlockSpec((Cl, 1), lambda n: (0, 0)),              # out BN scale
            pl.BlockSpec((Cl, 1), lambda n: (0, 0)),              # out BN bias
        ],
        out_specs=pl.BlockSpec((1, Cl, HW), lambda n: (n, 0, 0)),
        compiler_params=pltpu.CompilerParams(
            dimension_semantics=("parallel",)),
    )(xpf, hif, p["wdw"], p["bdw"], p["w_aspp"], p["b_aspp"], ut,
      p["w_out"], p["s_out"], p["b_out"])
    return out_flat.reshape(N, Cl, H, W)


# ------------------------- pure-JAX reference check --------------------------

def upsample_bilinear_2x(x):
    """NCHW bilinear 2x upsample, align_corners=True (nn.UpsamplingBilinear2d)."""
    n, c, h, w = x.shape
    ho, wo = 2 * h, 2 * w
    ys = jnp.arange(ho, dtype=jnp.float32) * (h - 1) / (ho - 1)
    xs = jnp.arange(wo, dtype=jnp.float32) * (w - 1) / (wo - 1)
    y0 = jnp.floor(ys).astype(jnp.int32); y1 = jnp.minimum(y0 + 1, h - 1)
    x0 = jnp.floor(xs).astype(jnp.int32); x1 = jnp.minimum(x0 + 1, w - 1)
    wy = (ys - y0.astype(jnp.float32))[None, None, :, None]
    wx = (xs - x0.astype(jnp.float32))[None, None, None, :]
    g = lambda yi, xi: x[:, :, yi][:, :, :, xi]
    top = g(y0, x0) * (1.0 - wx) + g(y0, x1) * wx
    bot = g(y1, x0) * (1.0 - wx) + g(y1, x1) * wx
    return top * (1.0 - wy) + bot * wy


def ffm_reference(low, high, raw):
    n, cl, h, w = low.shape
    ch = high.shape[1]
    if high.shape[2] != h:
        high = upsample_bilinear_2x(high)
    feats = [low]
    for b, d in enumerate(DILATIONS):
        y = lax.conv_general_dilated(
            low, raw["wdw"][b], (1, 1), [(d, d), (d, d)], rhs_dilation=(d, d),
            dimension_numbers=("NCHW", "OIHW", "NCHW"), feature_group_count=cl)
        s = raw["dw_gamma"][b] / jnp.sqrt(raw["dw_var"][b] + BN_EPS)
        y = y * s[None, :, None, None] + (
            raw["dw_beta"][b] - raw["dw_mean"][b] * s)[None, :, None, None]
        feats.append(jnp.clip(y, 0.0, 6.0))
    cat = jnp.concatenate(feats, axis=1)
    feat = jnp.einsum("nchw,oc->nohw", cat, raw["w_aspp"].reshape(ch, 4 * cl))
    feat = jnp.clip(feat + raw["b_aspp"][None, :, None, None], 0.0, 6.0)
    cat2 = jnp.concatenate([feat, high], axis=1)
    y = jnp.einsum("nchw,oc->nohw", cat2, raw["w_out"].reshape(cl, 2 * ch))
    s2 = raw["out_gamma"] / jnp.sqrt(raw["out_var"] + BN_EPS)
    y = y * s2[None, :, None, None] + (
        raw["out_beta"] - raw["out_mean"] * s2)[None, :, None, None]
    return jnp.clip(y, 0.0, 6.0) + low


# ---------------------------------- main -------------------------------------

if __name__ == "__main__":
    key = jax.random.PRNGKey(0)
    k_low, k_high, k_param = jax.random.split(key, 3)

    N, Cl, Ch, H, W = 2, 4, 8, 16, 16
    low = jax.random.normal(k_low, (N, Cl, H, W), jnp.float32)            # NCHW
    high = jax.random.normal(k_high, (N, Ch, H // 2, W // 2), jnp.float32)

    raw = init_params(k_param, Cl, Ch)
    kparams = fold_params(raw)

    out = jax.block_until_ready(ffm_forward(low, high, kparams))
    assert out.shape == (N, Cl, H, W)

    ref = ffm_reference(low, high, raw)
    err = float(jnp.max(jnp.abs(out - ref)))
    # tolerance covers possible MXU input rounding of the matrix-based
    # in-kernel upsample/BN-fold vs. the exact gather/lerp + post-scale reference
    assert jnp.allclose(out, ref, atol=2e-2, rtol=2e-2), err
    print("KERNEL_OK")
</pallas_src>

<mosaic_0001>
module attributes {stable_mosaic.version = 11 : i64} {
  func.func @kernel(%arg0: i32, %arg1: memref<1x4x640xf32, #tpu.memory_space<vmem>>, %arg2: memref<1x8x64xf32, #tpu.memory_space<vmem>>, %arg3: memref<3x4x9xf32, #tpu.memory_space<vmem>>, %arg4: memref<3x4x1xf32, #tpu.memory_space<vmem>>, %arg5: memref<8x16xf32, #tpu.memory_space<vmem>>, %arg6: memref<8x1xf32, #tpu.memory_space<vmem>>, %arg7: memref<64x384xf32, #tpu.memory_space<vmem>>, %arg8: memref<4x16xf32, #tpu.memory_space<vmem>>, %arg9: memref<4x1xf32, #tpu.memory_space<vmem>>, %arg10: memref<4x1xf32, #tpu.memory_space<vmem>>, %arg11: memref<1x4x256xf32, #tpu.memory_space<vmem>>) attributes {dimension_semantics = [#tpu.dimension_semantics<parallel>], iteration_bounds = array<i64: 2>, scalar_prefetch = 0 : i64, scratch_operands = 0 : i64, tpu.core_type = #tpu.core_type<tc>, window_params = [{transform_indices = @transform_0, window_bounds = array<i64: 1, 4, 640>}, {transform_indices = @transform_1, window_bounds = array<i64: 1, 8, 64>}, {pipeline_mode = #tpu.pipeline_mode<synchronous>, transform_indices = @transform_2, window_bounds = array<i64: 3, 4, 9>}, {pipeline_mode = #tpu.pipeline_mode<synchronous>, transform_indices = @transform_3, window_bounds = array<i64: 3, 4, 1>}, {pipeline_mode = #tpu.pipeline_mode<synchronous>, transform_indices = @transform_4, window_bounds = array<i64: 8, 16>}, {pipeline_mode = #tpu.pipeline_mode<synchronous>, transform_indices = @transform_5, window_bounds = array<i64: 8, 1>}, {pipeline_mode = #tpu.pipeline_mode<synchronous>, transform_indices = @transform_6, window_bounds = array<i64: 64, 384>}, {pipeline_mode = #tpu.pipeline_mode<synchronous>, transform_indices = @transform_7, window_bounds = array<i64: 4, 16>}, {pipeline_mode = #tpu.pipeline_mode<synchronous>, transform_indices = @transform_8, window_bounds = array<i64: 4, 1>}, {pipeline_mode = #tpu.pipeline_mode<synchronous>, transform_indices = @transform_9, window_bounds = array<i64: 4, 1>}, {transform_indices = @transform_10, window_bounds = array<i64: 1, 4, 256>}]} {
    %c0 = arith.constant 0 : index
    %c0_0 = arith.constant 0 : index
    %c0_1 = arith.constant 0 : index
    %0 = vector.load %arg1[%c0, %c0_0, %c0_1] : memref<1x4x640xf32, #tpu.memory_space<vmem>>, vector<1x4x640xf32>
    %1 = vector.shape_cast %0 : vector<1x4x640xf32> to vector<4x640xf32>
    %2 = vector.extract_strided_slice %1 {offsets = [0, 100], sizes = [4, 384], strides = [1, 1]} : vector<4x640xf32> to vector<4x384xf32>
    %c0_2 = arith.constant 0 : index
    %c0_3 = arith.constant 0 : index
    %c0_4 = arith.constant 0 : index
    %3 = vector.load %arg3[%c0_2, %c0_3, %c0_4] : memref<3x4x9xf32, #tpu.memory_space<vmem>>, vector<1x4x9xf32>
    %4 = vector.shape_cast %3 : vector<1x4x9xf32> to vector<4x9xf32>
    %cst = arith.constant 0.000000e+00 : f32
    %5 = vector.broadcast %cst : f32 to vector<4x384xf32>
    %6 = vector.extract_strided_slice %1 {offsets = [0, 75], sizes = [4, 384], strides = [1, 1]} : vector<4x640xf32> to vector<4x384xf32>
    %7 = vector.extract_strided_slice %4 {offsets = [0, 0], sizes = [4, 1], strides = [1, 1]} : vector<4x9xf32> to vector<4x1xf32>
    %8 = vector.broadcast %7 : vector<4x1xf32> to vector<4x384xf32>
    %9 = arith.mulf %6, %8 : vector<4x384xf32>
    %10 = arith.addf %5, %9 : vector<4x384xf32>
    %11 = vector.extract_strided_slice %1 {offsets = [0, 76], sizes = [4, 384], strides = [1, 1]} : vector<4x640xf32> to vector<4x384xf32>
    %12 = vector.extract_strided_slice %4 {offsets = [0, 1], sizes = [4, 1], strides = [1, 1]} : vector<4x9xf32> to vector<4x1xf32>
    %13 = vector.broadcast %12 : vector<4x1xf32> to vector<4x384xf32>
    %14 = arith.mulf %11, %13 : vector<4x384xf32>
    %15 = arith.addf %10, %14 : vector<4x384xf32>
    %16 = vector.extract_strided_slice %1 {offsets = [0, 77], sizes = [4, 384], strides = [1, 1]} : vector<4x640xf32> to vector<4x384xf32>
    %17 = vector.extract_strided_slice %4 {offsets = [0, 2], sizes = [4, 1], strides = [1, 1]} : vector<4x9xf32> to vector<4x1xf32>
    %18 = vector.broadcast %17 : vector<4x1xf32> to vector<4x384xf32>
    %19 = arith.mulf %16, %18 : vector<4x384xf32>
    %20 = arith.addf %15, %19 : vector<4x384xf32>
    %21 = vector.extract_strided_slice %1 {offsets = [0, 99], sizes = [4, 384], strides = [1, 1]} : vector<4x640xf32> to vector<4x384xf32>
    %22 = vector.extract_strided_slice %4 {offsets = [0, 3], sizes = [4, 1], strides = [1, 1]} : vector<4x9xf32> to vector<4x1xf32>
    %23 = vector.broadcast %22 : vector<4x1xf32> to vector<4x384xf32>
    %24 = arith.mulf %21, %23 : vector<4x384xf32>
    %25 = arith.addf %20, %24 : vector<4x384xf32>
    %26 = vector.extract_strided_slice %1 {offsets = [0, 100], sizes = [4, 384], strides = [1, 1]} : vector<4x640xf32> to vector<4x384xf32>
    %27 = vector.extract_strided_slice %4 {offsets = [0, 4], sizes = [4, 1], strides = [1, 1]} : vector<4x9xf32> to vector<4x1xf32>
    %28 = vector.broadcast %27 : vector<4x1xf32> to vector<4x384xf32>
    %29 = arith.mulf %26, %28 : vector<4x384xf32>
    %30 = arith.addf %25, %29 : vector<4x384xf32>
    %31 = vector.extract_strided_slice %1 {offsets = [0, 101], sizes = [4, 384], strides = [1, 1]} : vector<4x640xf32> to vector<4x384xf32>
    %32 = vector.extract_strided_slice %4 {offsets = [0, 5], sizes = [4, 1], strides = [1, 1]} : vector<4x9xf32> to vector<4x1xf32>
    %33 = vector.broadcast %32 : vector<4x1xf32> to vector<4x384xf32>
    %34 = arith.mulf %31, %33 : vector<4x384xf32>
    %35 = arith.addf %30, %34 : vector<4x384xf32>
    %36 = vector.extract_strided_slice %1 {offsets = [0, 123], sizes = [4, 384], strides = [1, 1]} : vector<4x640xf32> to vector<4x384xf32>
    %37 = vector.extract_strided_slice %4 {offsets = [0, 6], sizes = [4, 1], strides = [1, 1]} : vector<4x9xf32> to vector<4x1xf32>
    %38 = vector.broadcast %37 : vector<4x1xf32> to vector<4x384xf32>
    %39 = arith.mulf %36, %38 : vector<4x384xf32>
    %40 = arith.addf %35, %39 : vector<4x384xf32>
    %41 = vector.extract_strided_slice %1 {offsets = [0, 124], sizes = [4, 384], strides = [1, 1]} : vector<4x640xf32> to vector<4x384xf32>
    %42 = vector.extract_strided_slice %4 {offsets = [0, 7], sizes = [4, 1], strides = [1, 1]} : vector<4x9xf32> to vector<4x1xf32>
    %43 = vector.broadcast %42 : vector<4x1xf32> to vector<4x384xf32>
    %44 = arith.mulf %41, %43 : vector<4x384xf32>
    %45 = arith.addf %40, %44 : vector<4x384xf32>
    %46 = vector.extract_strided_slice %1 {offsets = [0, 125], sizes = [4, 384], strides = [1, 1]} : vector<4x640xf32> to vector<4x384xf32>
    %47 = vector.extract_strided_slice %4 {offsets = [0, 8], sizes = [4, 1], strides = [1, 1]} : vector<4x9xf32> to vector<4x1xf32>
    %48 = vector.broadcast %47 : vector<4x1xf32> to vector<4x384xf32>
    %49 = arith.mulf %46, %48 : vector<4x384xf32>
    %50 = arith.addf %45, %49 : vector<4x384xf32>
    %c0_5 = arith.constant 0 : index
    %c0_6 = arith.constant 0 : index
    %c0_7 = arith.constant 0 : index
    %51 = vector.load %arg4[%c0_5, %c0_6, %c0_7] : memref<3x4x1xf32, #tpu.memory_space<vmem>>, vector<1x4x1xf32>
    %52 = vector.shape_cast %51 : vector<1x4x1xf32> to vector<4x1xf32>
    %53 = vector.broadcast %52 : vector<4x1xf32> to vector<4x384xf32>
    %54 = arith.addf %50, %53 : vector<4x384xf32>
    %cst_8 = arith.constant 0.000000e+00 : f32
    %cst_9 = arith.constant 6.000000e+00 : f32
    %55 = vector.broadcast %cst_8 : f32 to vector<4x384xf32>
    %56 = arith.maximumf %55, %54 : vector<4x384xf32>
    %57 = vector.broadcast %cst_9 : f32 to vector<4x384xf32>
    %58 = arith.minimumf %57, %56 : vector<4x384xf32>
    %c1 = arith.constant 1 : index
    %c0_10 = arith.constant 0 : index
    %c0_11 = arith.constant 0 : index
    %59 = vector.load %arg3[%c1, %c0_10, %c0_11] : memref<3x4x9xf32, #tpu.memory_space<vmem>>, vector<1x4x9xf32>
    %60 = vector.shape_cast %59 : vector<1x4x9xf32> to vector<4x9xf32>
    %cst_12 = arith.constant 0.000000e+00 : f32
    %61 = vector.broadcast %cst_12 : f32 to vector<4x384xf32>
    %62 = vector.extract_strided_slice %1 {offsets = [0, 50], sizes = [4, 384], strides = [1, 1]} : vector<4x640xf32> to vector<4x384xf32>
    %63 = vector.extract_strided_slice %60 {offsets = [0, 0], sizes = [4, 1], strides = [1, 1]} : vector<4x9xf32> to vector<4x1xf32>
    %64 = vector.broadcast %63 : vector<4x1xf32> to vector<4x384xf32>
    %65 = arith.mulf %62, %64 : vector<4x384xf32>
    %66 = arith.addf %61, %65 : vector<4x384xf32>
    %67 = vector.extract_strided_slice %1 {offsets = [0, 52], sizes = [4, 384], strides = [1, 1]} : vector<4x640xf32> to vector<4x384xf32>
    %68 = vector.extract_strided_slice %60 {offsets = [0, 1], sizes = [4, 1], strides = [1, 1]} : vector<4x9xf32> to vector<4x1xf32>
    %69 = vector.broadcast %68 : vector<4x1xf32> to vector<4x384xf32>
    %70 = arith.mulf %67, %69 : vector<4x384xf32>
    %71 = arith.addf %66, %70 : vector<4x384xf32>
    %72 = vector.extract_strided_slice %1 {offsets = [0, 54], sizes = [4, 384], strides = [1, 1]} : vector<4x640xf32> to vector<4x384xf32>
    %73 = vector.extract_strided_slice %60 {offsets = [0, 2], sizes = [4, 1], strides = [1, 1]} : vector<4x9xf32> to vector<4x1xf32>
    %74 = vector.broadcast %73 : vector<4x1xf32> to vector<4x384xf32>
    %75 = arith.mulf %72, %74 : vector<4x384xf32>
    %76 = arith.addf %71, %75 : vector<4x384xf32>
    %77 = vector.extract_strided_slice %1 {offsets = [0, 98], sizes = [4, 384], strides = [1, 1]} : vector<4x640xf32> to vector<4x384xf32>
    %78 = vector.extract_strided_slice %60 {offsets = [0, 3], sizes = [4, 1], strides = [1, 1]} : vector<4x9xf32> to vector<4x1xf32>
    %79 = vector.broadcast %78 : vector<4x1xf32> to vector<4x384xf32>
    %80 = arith.mulf %77, %79 : vector<4x384xf32>
    %81 = arith.addf %76, %80 : vector<4x384xf32>
    %82 = vector.extract_strided_slice %1 {offsets = [0, 100], sizes = [4, 384], strides = [1, 1]} : vector<4x640xf32> to vector<4x384xf32>
    %83 = vector.extract_strided_slice %60 {offsets = [0, 4], sizes = [4, 1], strides = [1, 1]} : vector<4x9xf32> to vector<4x1xf32>
    %84 = vector.broadcast %83 : vector<4x1xf32> to vector<4x384xf32>
    %85 = arith.mulf %82, %84 : vector<4x384xf32>
    %86 = arith.addf %81, %85 : vector<4x384xf32>
    %87 = vector.extract_strided_slice %1 {offsets = [0, 102], sizes = [4, 384], strides = [1, 1]} : vector<4x640xf32> to vector<4x384xf32>
    %88 = vector.extract_strided_slice %60 {offsets = [0, 5], sizes = [4, 1], strides = [1, 1]} : vector<4x9xf32> to vector<4x1xf32>
    %89 = vector.broadcast %88 : vector<4x1xf32> to vector<4x384xf32>
    %90 = arith.mulf %87, %89 : vector<4x384xf32>
    %91 = arith.addf %86, %90 : vector<4x384xf32>
    %92 = vector.extract_strided_slice %1 {offsets = [0, 146], sizes = [4, 384], strides = [1, 1]} : vector<4x640xf32> to vector<4x384xf32>
    %93 = vector.extract_strided_slice %60 {offsets = [0, 6], sizes = [4, 1], strides = [1, 1]} : vector<4x9xf32> to vector<4x1xf32>
    %94 = vector.broadcast %93 : vector<4x1xf32> to vector<4x384xf32>
    %95 = arith.mulf %92, %94 : vector<4x384xf32>
    %96 = arith.addf %91, %95 : vector<4x384xf32>
    %97 = vector.extract_strided_slice %1 {offsets = [0, 148], sizes = [4, 384], strides = [1, 1]} : vector<4x640xf32> to vector<4x384xf32>
    %98 = vector.extract_strided_slice %60 {offsets = [0, 7], sizes = [4, 1], strides = [1, 1]} : vector<4x9xf32> to vector<4x1xf32>
    %99 = vector.broadcast %98 : vector<4x1xf32> to vector<4x384xf32>
    %100 = arith.mulf %97, %99 : vector<4x384xf32>
    %101 = arith.addf %96, %100 : vector<4x384xf32>
    %102 = vector.extract_strided_slice %1 {offsets = [0, 150], sizes = [4, 384], strides = [1, 1]} : vector<4x640xf32> to vector<4x384xf32>
    %103 = vector.extract_strided_slice %60 {offsets = [0, 8], sizes = [4, 1], strides = [1, 1]} : vector<4x9xf32> to vector<4x1xf32>
    %104 = vector.broadcast %103 : vector<4x1xf32> to vector<4x384xf32>
    %105 = arith.mulf %102, %104 : vector<4x384xf32>
    %106 = arith.addf %101, %105 : vector<4x384xf32>
    %c1_13 = arith.constant 1 : index
    %c0_14 = arith.constant 0 : index
    %c0_15 = arith.constant 0 : index
    %107 = vector.load %arg4[%c1_13, %c0_14, %c0_15] : memref<3x4x1xf32, #tpu.memory_space<vmem>>, vector<1x4x1xf32>
    %108 = vector.shape_cast %107 : vector<1x4x1xf32> to vector<4x1xf32>
    %109 = vector.broadcast %108 : vector<4x1xf32> to vector<4x384xf32>
    %110 = arith.addf %106, %109 : vector<4x384xf32>
    %cst_16 = arith.constant 0.000000e+00 : f32
    %cst_17 = arith.constant 6.000000e+00 : f32
    %111 = vector.broadcast %cst_16 : f32 to vector<4x384xf32>
    %112 = arith.maximumf %111, %110 : vector<4x384xf32>
    %113 = vector.broadcast %cst_17 : f32 to vector<4x384xf32>
    %114 = arith.minimumf %113, %112 : vector<4x384xf32>
    %c2 = arith.constant 2 : index
    %c0_18 = arith.constant 0 : index
    %c0_19 = arith.constant 0 : index
    %115 = vector.load %arg3[%c2, %c0_18, %c0_19] : memref<3x4x9xf32, #tpu.memory_space<vmem>>, vector<1x4x9xf32>
    %116 = vector.shape_cast %115 : vector<1x4x9xf32> to vector<4x9xf32>
    %cst_20 = arith.constant 0.000000e+00 : f32
    %117 = vector.broadcast %cst_20 : f32 to vector<4x384xf32>
    %118 = vector.extract_strided_slice %1 {offsets = [0, 0], sizes = [4, 384], strides = [1, 1]} : vector<4x640xf32> to vector<4x384xf32>
    %119 = vector.extract_strided_slice %116 {offsets = [0, 0], sizes = [4, 1], strides = [1, 1]} : vector<4x9xf32> to vector<4x1xf32>
    %120 = vector.broadcast %119 : vector<4x1xf32> to vector<4x384xf32>
    %121 = arith.mulf %118, %120 : vector<4x384xf32>
    %122 = arith.addf %117, %121 : vector<4x384xf32>
    %123 = vector.extract_strided_slice %1 {offsets = [0, 4], sizes = [4, 384], strides = [1, 1]} : vector<4x640xf32> to vector<4x384xf32>
    %124 = vector.extract_strided_slice %116 {offsets = [0, 1], sizes = [4, 1], strides = [1, 1]} : vector<4x9xf32> to vector<4x1xf32>
    %125 = vector.broadcast %124 : vector<4x1xf32> to vector<4x384xf32>
    %126 = arith.mulf %123, %125 : vector<4x384xf32>
    %127 = arith.addf %122, %126 : vector<4x384xf32>
    %128 = vector.extract_strided_slice %1 {offsets = [0, 8], sizes = [4, 384], strides = [1, 1]} : vector<4x640xf32> to vector<4x384xf32>
    %129 = vector.extract_strided_slice %116 {offsets = [0, 2], sizes = [4, 1], strides = [1, 1]} : vector<4x9xf32> to vector<4x1xf32>
    %130 = vector.broadcast %129 : vector<4x1xf32> to vector<4x384xf32>
    %131 = arith.mulf %128, %130 : vector<4x384xf32>
    %132 = arith.addf %127, %131 : vector<4x384xf32>
    %133 = vector.extract_strided_slice %1 {offsets = [0, 96], sizes = [4, 384], strides = [1, 1]} : vector<4x640xf32> to vector<4x384xf32>
    %134 = vector.extract_strided_slice %116 {offsets = [0, 3], sizes = [4, 1], strides = [1, 1]} : vector<4x9xf32> to vector<4x1xf32>
    %135 = vector.broadcast %134 : vector<4x1xf32> to vector<4x384xf32>
    %136 = arith.mulf %133, %135 : vector<4x384xf32>
    %137 = arith.addf %132, %136 : vector<4x384xf32>
    %138 = vector.extract_strided_slice %1 {offsets = [0, 100], sizes = [4, 384], strides = [1, 1]} : vector<4x640xf32> to vector<4x384xf32>
    %139 = vector.extract_strided_slice %116 {offsets = [0, 4], sizes = [4, 1], strides = [1, 1]} : vector<4x9xf32> to vector<4x1xf32>
    %140 = vector.broadcast %139 : vector<4x1xf32> to vector<4x384xf32>
    %141 = arith.mulf %138, %140 : vector<4x384xf32>
    %142 = arith.addf %137, %141 : vector<4x384xf32>
    %143 = vector.extract_strided_slice %1 {offsets = [0, 104], sizes = [4, 384], strides = [1, 1]} : vector<4x640xf32> to vector<4x384xf32>
    %144 = vector.extract_strided_slice %116 {offsets = [0, 5], sizes = [4, 1], strides = [1, 1]} : vector<4x9xf32> to vector<4x1xf32>
    %145 = vector.broadcast %144 : vector<4x1xf32> to vector<4x384xf32>
    %146 = arith.mulf %143, %145 : vector<4x384xf32>
    %147 = arith.addf %142, %146 : vector<4x384xf32>
    %148 = vector.extract_strided_slice %1 {offsets = [0, 192], sizes = [4, 384], strides = [1, 1]} : vector<4x640xf32> to vector<4x384xf32>
    %149 = vector.extract_strided_slice %116 {offsets = [0, 6], sizes = [4, 1], strides = [1, 1]} : vector<4x9xf32> to vector<4x1xf32>
    %150 = vector.broadcast %149 : vector<4x1xf32> to vector<4x384xf32>
    %151 = arith.mulf %148, %150 : vector<4x384xf32>
    %152 = arith.addf %147, %151 : vector<4x384xf32>
    %153 = vector.extract_strided_slice %1 {offsets = [0, 196], sizes = [4, 384], strides = [1, 1]} : vector<4x640xf32> to vector<4x384xf32>
    %154 = vector.extract_strided_slice %116 {offsets = [0, 7], sizes = [4, 1], strides = [1, 1]} : vector<4x9xf32> to vector<4x1xf32>
    %155 = vector.broadcast %154 : vector<4x1xf32> to vector<4x384xf32>
    %156 = arith.mulf %153, %155 : vector<4x384xf32>
    %157 = arith.addf %152, %156 : vector<4x384xf32>
    %158 = vector.extract_strided_slice %1 {offsets = [0, 200], sizes = [4, 384], strides = [1, 1]} : vector<4x640xf32> to vector<4x384xf32>
    %159 = vector.extract_strided_slice %116 {offsets = [0, 8], sizes = [4, 1], strides = [1, 1]} : vector<4x9xf32> to vector<4x1xf32>
    %160 = vector.broadcast %159 : vector<4x1xf32> to vector<4x384xf32>
    %161 = arith.mulf %158, %160 : vector<4x384xf32>
    %162 = arith.addf %157, %161 : vector<4x384xf32>
    %c2_21 = arith.constant 2 : index
    %c0_22 = arith.constant 0 : index
    %c0_23 = arith.constant 0 : index
    %163 = vector.load %arg4[%c2_21, %c0_22, %c0_23] : memref<3x4x1xf32, #tpu.memory_space<vmem>>, vector<1x4x1xf32>
    %164 = vector.shape_cast %163 : vector<1x4x1xf32> to vector<4x1xf32>
    %165 = vector.broadcast %164 : vector<4x1xf32> to vector<4x384xf32>
    %166 = arith.addf %162, %165 : vector<4x384xf32>
    %cst_24 = arith.constant 0.000000e+00 : f32
    %cst_25 = arith.constant 6.000000e+00 : f32
    %167 = vector.broadcast %cst_24 : f32 to vector<4x384xf32>
    %168 = arith.maximumf %167, %166 : vector<4x384xf32>
    %169 = vector.broadcast %cst_25 : f32 to vector<4x384xf32>
    %170 = arith.minimumf %169, %168 : vector<4x384xf32>
    %171 = tpu.concatenate %2, %58, %114, %170 in 0 : vector<4x384xf32>, vector<4x384xf32>, vector<4x384xf32>, vector<4x384xf32> -> vector<16x384xf32>
    %c0_26 = arith.constant 0 : index
    %c0_27 = arith.constant 0 : index
    %172 = vector.load %arg5[%c0_26, %c0_27] : memref<8x16xf32, #tpu.memory_space<vmem>>, vector<8x16xf32>
    %cst_28 = arith.constant dense<0.000000e+00> : vector<8x384xf32>
    %173 = tpu.matmul %172, %171, %cst_28 {dimension_numbers = #tpu.dot_dimension_numbers<[1], [0], [0], [1], [0, 0, 1, 1], [], []>} : vector<8x16xf32>, vector<16x384xf32>, vector<8x384xf32> -> vector<8x384xf32>
    %c0_29 = arith.constant 0 : index
    %c0_30 = arith.constant 0 : index
    %174 = vector.load %arg6[%c0_29, %c0_30] : memref<8x1xf32, #tpu.memory_space<vmem>>, vector<8x1xf32>
    %175 = vector.broadcast %174 : vector<8x1xf32> to vector<8x384xf32>
    %176 = arith.addf %173, %175 : vector<8x384xf32>
    %cst_31 = arith.constant 0.000000e+00 : f32
    %cst_32 = arith.constant 6.000000e+00 : f32
    %177 = vector.broadcast %cst_31 : f32 to vector<8x384xf32>
    %178 = arith.maximumf %177, %176 : vector<8x384xf32>
    %179 = vector.broadcast %cst_32 : f32 to vector<8x384xf32>
    %180 = arith.minimumf %179, %178 : vector<8x384xf32>
    %c0_33 = arith.constant 0 : index
    %c0_34 = arith.constant 0 : index
    %c0_35 = arith.constant 0 : index
    %181 = vector.load %arg2[%c0_33, %c0_34, %c0_35] : memref<1x8x64xf32, #tpu.memory_space<vmem>>, vector<1x8x64xf32>
    %182 = vector.shape_cast %181 : vector<1x8x64xf32> to vector<8x64xf32>
    %c0_36 = arith.constant 0 : index
    %c0_37 = arith.constant 0 : index
    %183 = vector.load %arg7[%c0_36, %c0_37] : memref<64x384xf32, #tpu.memory_space<vmem>>, vector<64x384xf32>
    %cst_38 = arith.constant dense<0.000000e+00> : vector<8x384xf32>
    %184 = tpu.matmul %182, %183, %cst_38 {dimension_numbers = #tpu.dot_dimension_numbers<[1], [0], [0], [1], [0, 0, 1, 1], [], []>} : vector<8x64xf32>, vector<64x384xf32>, vector<8x384xf32> -> vector<8x384xf32>
    %185 = tpu.concatenate %180, %184 in 0 : vector<8x384xf32>, vector<8x384xf32> -> vector<16x384xf32>
    %c0_39 = arith.constant 0 : index
    %c0_40 = arith.constant 0 : index
    %186 = vector.load %arg8[%c0_39, %c0_40] : memref<4x16xf32, #tpu.memory_space<vmem>>, vector<4x16xf32>
    %cst_41 = arith.constant dense<0.000000e+00> : vector<4x384xf32>
    %187 = tpu.matmul %186, %185, %cst_41 {dimension_numbers = #tpu.dot_dimension_numbers<[1], [0], [0], [1], [0, 0, 1, 1], [], []>} : vector<4x16xf32>, vector<16x384xf32>, vector<4x384xf32> -> vector<4x384xf32>
    %c0_42 = arith.constant 0 : index
    %c0_43 = arith.constant 0 : index
    %188 = vector.load %arg9[%c0_42, %c0_43] : memref<4x1xf32, #tpu.memory_space<vmem>>, vector<4x1xf32>
    %189 = vector.broadcast %188 : vector<4x1xf32> to vector<4x384xf32>
    %190 = arith.mulf %187, %189 : vector<4x384xf32>
    %c0_44 = arith.constant 0 : index
    %c0_45 = arith.constant 0 : index
    %191 = vector.load %arg10[%c0_44, %c0_45] : memref<4x1xf32, #tpu.memory_space<vmem>>, vector<4x1xf32>
    %192 = vector.broadcast %191 : vector<4x1xf32> to vector<4x384xf32>
    %193 = arith.addf %190, %192 : vector<4x384xf32>
    %cst_46 = arith.constant 0.000000e+00 : f32
    %cst_47 = arith.constant 6.000000e+00 : f32
    %194 = vector.broadcast %cst_46 : f32 to vector<4x384xf32>
    %195 = arith.maximumf %194, %193 : vector<4x384xf32>
    %196 = vector.broadcast %cst_47 : f32 to vector<4x384xf32>
    %197 = arith.minimumf %196, %195 : vector<4x384xf32>
    %198 = arith.addf %197, %2 : vector<4x384xf32>
    %199 = vector.extract_strided_slice %198 {offsets = [0, 0], sizes = [4, 16], strides = [1, 1]} : vector<4x384xf32> to vector<4x16xf32>
    %200 = vector.extract_strided_slice %198 {offsets = [0, 24], sizes = [4, 16], strides = [1, 1]} : vector<4x384xf32> to vector<4x16xf32>
    %201 = vector.extract_strided_slice %198 {offsets = [0, 48], sizes = [4, 16], strides = [1, 1]} : vector<4x384xf32> to vector<4x16xf32>
    %202 = vector.extract_strided_slice %198 {offsets = [0, 72], sizes = [4, 16], strides = [1, 1]} : vector<4x384xf32> to vector<4x16xf32>
    %203 = vector.extract_strided_slice %198 {offsets = [0, 96], sizes = [4, 16], strides = [1, 1]} : vector<4x384xf32> to vector<4x16xf32>
    %204 = vector.extract_strided_slice %198 {offsets = [0, 120], sizes = [4, 16], strides = [1, 1]} : vector<4x384xf32> to vector<4x16xf32>
    %205 = vector.extract_strided_slice %198 {offsets = [0, 144], sizes = [4, 16], strides = [1, 1]} : vector<4x384xf32> to vector<4x16xf32>
    %206 = vector.extract_strided_slice %198 {offsets = [0, 168], sizes = [4, 16], strides = [1, 1]} : vector<4x384xf32> to vector<4x16xf32>
    %207 = vector.extract_strided_slice %198 {offsets = [0, 192], sizes = [4, 16], strides = [1, 1]} : vector<4x384xf32> to vector<4x16xf32>
    %208 = vector.extract_strided_slice %198 {offsets = [0, 216], sizes = [4, 16], strides = [1, 1]} : vector<4x384xf32> to vector<4x16xf32>
    %209 = vector.extract_strided_slice %198 {offsets = [0, 240], sizes = [4, 16], strides = [1, 1]} : vector<4x384xf32> to vector<4x16xf32>
    %210 = vector.extract_strided_slice %198 {offsets = [0, 264], sizes = [4, 16], strides = [1, 1]} : vector<4x384xf32> to vector<4x16xf32>
    %211 = vector.extract_strided_slice %198 {offsets = [0, 288], sizes = [4, 16], strides = [1, 1]} : vector<4x384xf32> to vector<4x16xf32>
    %212 = vector.extract_strided_slice %198 {offsets = [0, 312], sizes = [4, 16], strides = [1, 1]} : vector<4x384xf32> to vector<4x16xf32>
    %213 = vector.extract_strided_slice %198 {offsets = [0, 336], sizes = [4, 16], strides = [1, 1]} : vector<4x384xf32> to vector<4x16xf32>
    %214 = vector.extract_strided_slice %198 {offsets = [0, 360], sizes = [4, 16], strides = [1, 1]} : vector<4x384xf32> to vector<4x16xf32>
    %215 = tpu.concatenate %199, %200, %201, %202, %203, %204, %205, %206, %207, %208, %209, %210, %211, %212, %213, %214 in 1 : vector<4x16xf32>, vector<4x16xf32>, vector<4x16xf32>, vector<4x16xf32>, vector<4x16xf32>, vector<4x16xf32>, vector<4x16xf32>, vector<4x16xf32>, vector<4x16xf32>, vector<4x16xf32>, vector<4x16xf32>, vector<4x16xf32>, vector<4x16xf32>, vector<4x16xf32>, vector<4x16xf32>, vector<4x16xf32> -> vector<4x256xf32>
    %c0_48 = arith.constant 0 : index
    %c0_49 = arith.constant 0 : index
    %c0_50 = arith.constant 0 : index
    %216 = vector.load %arg11[%c0_48, %c0_49, %c0_50] : memref<1x4x256xf32, #tpu.memory_space<vmem>>, vector<1x4x256xf32>
    %217 = vector.shape_cast %216 : vector<1x4x256xf32> to vector<4x256xf32>
    %218 = vector.shape_cast %215 : vector<4x256xf32> to vector<1x4x256xf32>
    tpu.vector_store %arg11[%c0_48, %c0_49, %c0_50], %218 {strides = array<i32>} : memref<1x4x256xf32, #tpu.memory_space<vmem>>, vector<1x4x256xf32>,
    return
  }
  func.func @transform_0(%arg0: i32) -> (i32, i32, i32) {
    %c0_i32 = arith.constant 0 : i32
    %c0_i32_0 = arith.constant 0 : i32
    %c0_i32_1 = arith.constant 0 : i32
    return %arg0, %c0_i32, %c0_i32_0 : i32, i32, i32
  }
  func.func @transform_1(%arg0: i32) -> (i32, i32, i32) {
    %c0_i32 = arith.constant 0 : i32
    %c0_i32_0 = arith.constant 0 : i32
    %c0_i32_1 = arith.constant 0 : i32
    return %arg0, %c0_i32, %c0_i32_0 : i32, i32, i32
  }
  func.func @transform_2(%arg0: i32) -> (i32, i32, i32) {
    %c0_i32 = arith.constant 0 : i32
    %c0_i32_0 = arith.constant 0 : i32
    %c0_i32_1 = arith.constant 0 : i32
    %c0_i32_2 = arith.constant 0 : i32
    return %c0_i32, %c0_i32_0, %c0_i32_1 : i32, i32, i32
  }
  func.func @transform_3(%arg0: i32) -> (i32, i32, i32) {
    %c0_i32 = arith.constant 0 : i32
    %c0_i32_0 = arith.constant 0 : i32
    %c0_i32_1 = arith.constant 0 : i32
    %c0_i32_2 = arith.constant 0 : i32
    return %c0_i32, %c0_i32_0, %c0_i32_1 : i32, i32, i32
  }
  func.func @transform_4(%arg0: i32) -> (i32, i32) {
    %c0_i32 = arith.constant 0 : i32
    %c0_i32_0 = arith.constant 0 : i32
    %c0_i32_1 = arith.constant 0 : i32
    return %c0_i32, %c0_i32_0 : i32, i32
  }
  func.func @transform_5(%arg0: i32) -> (i32, i32) {
    %c0_i32 = arith.constant 0 : i32
    %c0_i32_0 = arith.constant 0 : i32
    %c0_i32_1 = arith.constant 0 : i32
    return %c0_i32, %c0_i32_0 : i32, i32
  }
  func.func @transform_6(%arg0: i32) -> (i32, i32) {
    %c0_i32 = arith.constant 0 : i32
    %c0_i32_0 = arith.constant 0 : i32
    %c0_i32_1 = arith.constant 0 : i32
    return %c0_i32, %c0_i32_0 : i32, i32
  }
  func.func @transform_7(%arg0: i32) -> (i32, i32) {
    %c0_i32 = arith.constant 0 : i32
    %c0_i32_0 = arith.constant 0 : i32
    %c0_i32_1 = arith.constant 0 : i32
    return %c0_i32, %c0_i32_0 : i32, i32
  }
  func.func @transform_8(%arg0: i32) -> (i32, i32) {
    %c0_i32 = arith.constant 0 : i32
    %c0_i32_0 = arith.constant 0 : i32
    %c0_i32_1 = arith.constant 0 : i32
    return %c0_i32, %c0_i32_0 : i32, i32
  }
  func.func @transform_9(%arg0: i32) -> (i32, i32) {
    %c0_i32 = arith.constant 0 : i32
    %c0_i32_0 = arith.constant 0 : i32
    %c0_i32_1 = arith.constant 0 : i32
    return %c0_i32, %c0_i32_0 : i32, i32
  }
  func.func @transform_10(%arg0: i32) -> (i32, i32, i32) {
    %c0_i32 = arith.constant 0 : i32
    %c0_i32_0 = arith.constant 0 : i32
    %c0_i32_1 = arith.constant 0 : i32
    return %arg0, %c0_i32, %c0_i32_0 : i32, i32, i32
  }
}

</mosaic_0001>

<bundles_post_ra>
// kernel: tpu_custom_call.1
= control target key start
LH: loop header
LB: loop body
LE: loop exit
PB: predicated region body
PF: predicated region fallthrough
CT: control target
= control target key end

     0   :  { %s2926_s0 = inlined_call_operand.hbm [shape: f32[2,4,640], index: 0, kind: input, shape index: {}]   ;;  %s2927_s1 = inlined_call_operand.vmem [shape: f32[2,8,64], index: 1, kind: input, shape index: {}]   ;;  %s2928_s2 = inlined_call_operand.hbm [shape: f32[3,4,9], index: 2, kind: input, shape index: {}]   ;;  %s2929_s3 = inlined_call_operand.vmem [shape: f32[3,4,1], index: 3, kind: input, shape index: {}]   ;;  %s2930_s4 = inlined_call_operand.vmem [shape: f32[8,16], index: 4, kind: input, shape index: {}]   ;;  %s2931_s5 = inlined_call_operand.vmem [shape: f32[8,1], index: 5, kind: input, shape index: {}]   ;;  %s2932_s6 = inlined_call_operand.hbm [shape: f32[64,384], index: 6, kind: input, shape index: {}]   ;;  %s2933_s7 = inlined_call_operand.vmem [shape: f32[4,16], index: 7, kind: input, shape index: {}]   ;;  %s2934_s8 = inlined_call_operand.vmem [shape: f32[4,1], index: 8, kind: input, shape index: {}]   ;;  %s2935_s9 = inlined_call_operand.vmem [shape: f32[4,1], index: 9, kind: input, shape index: {}]   ;;  %s2936_s10 = inlined_call_operand.hbm [shape: f32[2,4,256], index: 10, kind: output, shape index: {}]  }
   0x1   :  { %2941 = sst [smem:[#allocation16_spill]] %s2928_s2 }
   0x2   :  { %2942 = sst [smem:[#allocation17_spill]] %s2932_s6 }
   0x3   :  { %15 = vsyncpa [#allocation3], 0 }
   0x4   :  { %17 = vsyncpa [#allocation3 + $0x1], 0 }
   0x5   :  { %18 = vsyncpa [#allocation6], 0 }
   0x6   :  { %19 = vsyncpa [#allocation4], 0 }
   0x7   :  { %21 = vsyncpa [#allocation4 + $0x1], 0  ;;  %s2264_s13 = smov 0   ;;  %s2266_s14 = smov 0  }
   0x8   :  { %s2268_s15 = smov 0   ;;  %s2270_s16 = smov 0  }
   0x9 LB: > { %2943 = sst [smem:[#allocation12_spill]] %s2156_s15  ;;  %s2288_s20 = sadd.s32 4294967295, %s2160_s16   ;;  %s2160_s16 = sphi %s2270_s16, %s2956_s16   ;;  %s2156_s15 = sphi %s2268_s15, %s2958_s15   ;;  %s2152_s14 = sphi %s2266_s14, %s2960_s14   ;;  %s2148_s13 = sphi %s2264_s13, %s2959_s13  }
   0xa   : > { %2944 = sst [smem:[#allocation13_spill]] %s2160_s16  ;;  %p1787_p0 = scmp.ge.s32.totalorder %s2160_s16, 1 }
   0xb   : > { %s2945_s2 = sld [smem:[#allocation16_spill]]  ;;  %p48_p1 = scmp.eq.s32.totalorder %s2288_s20, 0 }
   0xc   : > { %p278_p2 = scmp.lt.s32.totalorder %s2160_s16, 3  ;;  %s2162_s22 = smov [#allocation5]  }
   0xd   : > { %s291_s23 = sshll.u32 %s2162_s22, 4  ;;  %s2947_s6 = sld [smem:[#allocation17_spill]]  ;;  %s292_s23 = int_to_ptr.vmem [resolvable:$true] %s291_s23 }
   0xe   : > { %p2293_p3 = pnand %p1787_p0, %p278_p2  ;;  %s2163_s27 = smov [#allocation7]  }
   0xf   : > { %s314_s28 = sshll.u32 %s2163_s27, 4  ;;  %s2164_s29 = smov 64   ;;  %s315_s28 = int_to_ptr.vmem [resolvable:$true] %s314_s28 }
  0x10   : > { %p1829_p4 = pneg %p2293_p3  ;;  %s2165_s30 = smov 4  }
  0x11   : > { %s289_s19 = sshll.u32 %s2945_s2, 4  ;;  %s2166_s11 = smov 384   ;;  %s290_s19 = int_to_ptr.hbm [resolvable:$true] %s289_s19 }
  0x12   : > { %p1830_p6 = pnand %p1829_p4, %p48_p1  ;;  %s2167_s12 = smov 24  }
  0x13   : > { %s312_s26 = sshll.u32 %s2947_s6, 4  ;;  %s1786_s17 = sadd.s32 4294967294, %s2160_s16   ;;  %s313_s26 = int_to_ptr.hbm [resolvable:$true] %s312_s26 }
  0x14   : > { %1832 = dma.hbm_to_vmem [thread:$0]  (!%p1830_p6), %s290_s19, 192, %s292_s23, [#allocation6], %s2164_s29, %s2164_s29, %s2165_s30  }
  0x15   : > { %1835 = dma.hbm_to_vmem [thread:$0]  (!%p1830_p6), %s313_s26, 3072, %s315_s28, [#allocation6], %s2166_s11, %s2166_s11, %s2167_s12  }
  0x16   : > { %s2307_s18 = sadd.s32 1, %s2160_s16   ;;  %s34_s24 = sadd.s32 1, %s2156_s15 }
  0x17   : > { %2948 = sst [smem:[#allocation14_spill]] %s2307_s18  ;;  %s31_s22 = ssub.s32 %s2160_s16, %s2307_s18 }
  0x18   : > { %p32_p7 = scmp.eq.s32.totalorder %s31_s22, 0  ;;  %p41_p8 = scmp.ne.s32.totalorder %s2156_s15, %s2152_s14 }
  0x19   : > { %p42_p9 = scmp.eq.s32.totalorder %s2160_s16, 0  ;;  %p47_p10 = scmp.ne.s32.totalorder %s2152_s14, %s2148_s13 }
  0x1a   : > { %s2318_s25 = scalar_select %p32_p7, %s2156_s15, %s34_s24  }
  0x1b   : > { %p43_p11 = por %p42_p9, %p41_p8  ;;  %p2322_p12 = por %p48_p1, %p47_p10 }
  0x1c   : > { %2949 = sst [smem:[#allocation15_spill]] %s2318_s25  ;;  %p265_p13 = scmp.eq.s32.totalorder %s2288_s20, 1 }
  0x1d   : > { %p271_p0 = scmp.eq.s32.totalorder %s1786_s17, 1  ;;  %p1846_p2 = scmp.lt.s32.totalorder %s2160_s16, 2 }
  0x1e   : > { %s337_s23 = sand.u32 1, %s2156_s15   ;;  %p2329_p4 = por %p265_p13, %p41_p8 }
  0x1f   : > { %p2333_p6 = por %p271_p0, %p47_p10  ;;  %s1814_s28 = smul.u32 20, %s337_s23 }
  0x20   : > { %s1815_s29 = smul.u32 20, %s2160_s16  ;;  %p2338_p7 = pnand %p1846_p2, %p43_p11 }
  0x21   : > { %s341_s22 = scalar_lea.vmem [#allocation2], %s1814_s28  ;;  %s338_s6 = scalar_lea.sflag [#allocation3], %s337_s23 }
  0x22   : > { %s346_s17 = scalar_lea.hbm %s2926_s0, %s1815_s29  ;;  %s350_s24 = sshll.u32 %s341_s22, 4  ;;  %s351_s24 = int_to_ptr.vmem [resolvable:$true] %s350_s24 }
  0x23   : > { %s348_s2 = sshll.u32 %s346_s17, 4  ;;  %p2064_p9 = pneg %p2338_p7  ;;  %s349_s2 = int_to_ptr.hbm [resolvable:$true] %s348_s2 }
  0x24   : > { %s2060_s25 = sshra.s32 %s349_s2, 4  ;;  %s2067_s11 = scalar_lea.hbm %s2926_s0, 40  ;;  %s2061_s25 = int_to_ptr.hbm [resolvable:$true] %s2060_s25 }
  0x25   : > { %s2062_s15 = scalar_lea.hbm %s2061_s25, 20  ;;  %p2068_p13 = scmp.lt.s32.totalorder %s2061_s25, %s2926_s0 }
  0x26   : > { %p2063_p8 = scmp.ne.s32.totalorder %s2061_s25, %s2062_s15  ;;  %p2069_p0 = scmp.lt.s32.totalorder %s2067_s11, %s2062_s15 }
  0x28   : > { %p2065_p10 = pnand %p2064_p9, %p2063_p8  ;;  %p2070_p2 = por %p2069_p0, %p2068_p13 }
  0x2a   : > { %p2066_p11 = pneg %p2065_p10 }
  0x2c   : > { %p2071_p5 = pnand %p2070_p2, %p2066_p11 }
  0x2e   : > { %2074 = shalt.err (!%p2071_p5)
}
  0x2f   : > { %1839 = dma.hbm_to_vmem [thread:$0]  (!%p2338_p7), %s349_s2, 320, %s351_s24, %s338_s6  }
  0x30   : > { %366 = sbr.rel (%p2293_p3) target bundleno = 1148 (0x47c), region = 60  ;;  %s2358_s23 = sand.u32 (!%p2293_p3), 1, %s2152_s14  }
  0x31   : > { %s1816_s16 = smul.u32 (!%p2293_p3), 20, %s2358_s23  ;;  %s369_s18 = scalar_lea.sflag (!%p2293_p3), [#allocation3], %s2358_s23 }
  0x33   : > { %s2362_s28 = scalar_lea.vmem (!%p2293_p3), [#allocation2], %s1816_s16 }
  0x35   : > { %2135 = dma.done.wait (%p2322_p12), %s369_s18, 320  }
  0x36   : > { %2137 = vsyncadd (%p2322_p12), %s369_s18, 4294966976 }
  0x37   : > { %2139 = dma.done.wait (%p48_p1), [#allocation6], 3264  }
  0x38   : > { %2141 = vsyncadd (%p48_p1), [#allocation6], 4294964032  ;;  %v2168_v0 = vmov 3   ;;  %v2169_v1 = vmov 2   ;;  %v2170_v2 = vmov 5   ;;  %v2378_v4 = vld [vmem:[%s2362_s28] sm:$0xff] }
  0x39   : > { %1931 = vset.pattern.permute.xlu1 %v2168_v0  ;;  %1929 = vset.pattern.permute.xlu0 %v2169_v1  ;;  %v2372_v3 = vld [vmem:[#allocation5] sm:$0xf]  ;;  %1189 = vst [vmem:[#allocation1] ss:$2 sm:$0xff] %v2378_v4  ;;  %v2171_v5 = vmov 4   ;;  %v2172_v6 = vmov 1  }
  0x3a   : > { %1933 = vset.pattern.permute.xlu2 %v2170_v2  ;;  %499 = vperm.xlu1 %1931, %v2372_v3   ;;  %v671_v7 = vld [vmem:[#allocation5 + $0x4] sm:$0xf]  ;;  %v2387_v9 = vld [vmem:[#allocation5 + $0x8] sm:$0xf]  ;;  %v2173_v10 = vmov 6   ;;  %v2174_v11 = vmov 7  }
  0x3b   : > { %473 = vperm.xlu0 %1929, %v2372_v3   ;;  %551 = vperm.xlu2 %1933, %v2372_v3   ;;  %v2384_v8 = vld [vmem:[%s2362_s28 + $0x8] sm:$0xff]  ;;  %v2175_v12 = vmov 8   ;;  %s2176_s2 = smov 108   ;;  %s2177_s6 = smov 110   ;;  %v2179_v13 = vmov 0   ;;  %vm463_vm0 = vcmask 1043456  }
  0x3c   : > { %1191 = vst [vmem:[#allocation1 + $0x10] ss:$2 sm:$0xff] %v2384_v8  ;;  %s2178_s15 = smov 106   ;;  %v2411_v14 = vld [vmem:[%s2362_s28 + $0x10] sm:$0xf]  ;;  %s2181_s21 = smov 126  }
  0x3d   : > { %v2180_v17 = vmov 839922192   ;;  %s2182_s25 = smov 104   ;;  %s2183_s19 = smov 127   ;;  %vm827_vm1 = vcmask 900096   ;;  %vm867_vm2 = vcmask 883712  }
  0x3e   : > { %v437_v18 = vunpack.c.l.s4 %v2180_v17  ;;  %s2184_s30 = smov 102   ;;  %s2185_s17 = smov 103   ;;  %vm906_vm3 = vcmask 867328   ;;  %vm465_vm4 = vcmask 1039360   ;;  %vm491_vm5 = vcmask 1031168  }
  0x3f   : > { %s2186_s22 = smov 80   ;;  %s2187_s24 = smov 79   ;;  %vm729_vm6 = vcmask 1014784   ;;  %vm595_vm7 = vcmask 654336   ;;  %vm517_vm8 = vcmask 850944   ;;  %vm543_vm9 = vcmask 842752  }
  0x40   : > { %v2421_v19 = vunpack.c.0.s8 %v437_v18  ;;  %s2188_s11 = smov 124   ;;  %s2189_s12 = smov 78   ;;  %vm569_vm10 = vcmask 834560   ;;  %vm621_vm11 = vcmask 646144   ;;  %vm647_vm12 = vcmask 637952  }
  0x41   : > { %s2190_s29 = smov 76   ;;  %s2191_s28 = smov 120   ;;  %vm805_vm13 = vcmask 621568   ;;  %vm847_vm14 = vcmask 408576   ;;  %vm1009_vm15 = vcmask 982016  }
  0x42   : > { %1932 = vset.pattern.permute.xlu1 %v2171_v5  ;;  %s2199_s16 = smov 25   ;;  %s2200_s18 = smov 100  }
  0x43   : > { %1930 = vset.pattern.permute.xlu0 %v2172_v6  ;;  %525 = vperm.xlu1 %1932, %v2372_v3   ;;  %p424_p1 = scmp.lt.s32.totalorder %s2288_s20, 1 }
  0x44   : > { %446 = vperm.xlu0 %1930, %v2372_v3   ;;  %1934 = vset.pattern.permute.xlu2 %v2172_v6 }
  0x45   : > { %686 = vperm.xlu2 %1934, %v671_v7  }
  0x4b   : > { %1935 = vset.pattern.permute.xlu1 %v2173_v10 }
  0x4c   : > { %966 = vperm.xlu0 %1930, %v2387_v9   ;;  %577 = vperm.xlu1 %1935, %v2372_v3  }
  0x4d   : > { %1936 = vset.pattern.permute.xlu2 %v2169_v1 }
  0x4e   : > { %711 = vperm.xlu2 %1936, %v671_v7  }
  0x54   : > { %1941 = vset.pattern.permute.xlu0 %v2174_v11  ;;  %1937 = vset.pattern.permute.xlu1 %v2168_v0 }
  0x55   : > { %603 = vperm.xlu0 %1941, %v2372_v3   ;;  %737 = vperm.xlu1 %1937, %v671_v7  }
  0x56   : > { %1938 = vset.pattern.permute.xlu2 %v2175_v12 }
  0x57   : > { %629 = vperm.xlu2 %1938, %v2372_v3  }
  0x5d   : > { %858 = vrot.lane.b32.xlu0 %v2378_v4, %s2176_s2  ;;  %1939 = vset.pattern.permute.xlu1 %v2171_v5 }
  0x5e   : > { %762 = vperm.xlu1 %1939, %v671_v7  }
  0x5f   : > { %1940 = vset.pattern.permute.xlu2 %v2170_v2 }
  0x60   : > { %787 = vperm.xlu2 %1940, %v671_v7  }
  0x65   : > { %856 = vperm.xlu0 %1941, %v671_v7  }
  0x66   : > { %818 = vrot.lane.b32.xlu1 %v2378_v4, %s2177_s6 }
  0x67   : > { %1942 = vset.pattern.permute.xlu1 %v2169_v1 }
  0x68   : > { %820 = vrot.lane.b32.xlu2 %v2384_v8, %s2177_s6 }
  0x69   : > { %1943 = vset.pattern.permute.xlu2 %v2173_v10 }
  0x6d   : > { %1946 = vset.pattern.permute.xlu0 %v2175_v12 }
  0x6e   : > { %895 = vperm.xlu0 %1946, %v671_v7   ;;  %991 = vperm.xlu1 %1942, %v2387_v9  }
  0x70   : > { %813 = vperm.xlu2 %1943, %v671_v7  }
  0x76   : > { %860 = vrot.lane.b32.xlu1 %v2384_v8, %s2176_s2  ;;  %1950 = vset.pattern.permute.xlu0 %v2179_v13 }
  0x77   : > { %1945 = vset.pattern.permute.xlu1 %v2171_v5 }
  0x78   : > { %1944 = vset.pattern.permute.xlu2 %v2168_v0 }
  0x79   : > { %1017 = vperm.xlu2 %1944, %v2387_v9  }
  0x7e   : > { %897 = vrot.lane.b32.xlu1 %v2378_v4, %s2178_s15 }
  0x81   : > { %899 = vrot.lane.b32.xlu2 %v2384_v8, %s2178_s15 }
  0x82   : > { %1948 = vset.pattern.permute.xlu2 %v2179_v13 }
  0x86   : > { %1043 = vperm.xlu1 %1945, %v2387_v9  }
  0x89   : > { %822 = vrot.lane.b32.xlu2 %v2411_v14, %s2177_s6  ;;  %s2193_s6 = smov 50  }
  0x8e   : > { %1947 = vset.pattern.permute.xlu1 %v2170_v2 }
  0x8f   : > { %1069 = vperm.xlu1 %1947, %v2387_v9  }
  0x91   : > { %862 = vrot.lane.b32.xlu2 %v2411_v14, %s2176_s2  ;;  %s2192_s2 = smov 32  }
  0x95   : > { %v552_v15 = vpop.permute.xlu2 %551 }
  0x96   : > { %v556_v33 = vperm.slane %v552_v15, %v2421_v19 }
  0x97   : > { %901 = vrot.lane.b32.xlu1 %v2411_v14, %s2178_s15  ;;  %s2194_s15 = smov 28  }
  0x98   : > { %1949 = vset.pattern.permute.xlu1 %v2179_v13  ;;  %v558_v34 = vmul.f32 %v556_v33, %v2378_v4  ;;  %v559_v51 = vmul.f32 %v556_v33, %v2384_v8 }
  0x99   : > { %434 = vperm.xlu2 %1948, %v2372_v3  }
  0x9f   : > { %v687_v16 = vpop.permute.xlu2 %686  ;;  %674 = vperm.xlu1 %1949, %v671_v7  }
  0xa0   : > { %v691_v38 = vperm.slane %v687_v16, %v2421_v19 }
  0xa2   : > { %v693_v41 = vmul.f32 %v691_v38, %v2378_v4  ;;  %v694_v58 = vmul.f32 %v691_v38, %v2384_v8 }
  0xa8   : > { %v712_v20 = vpop.permute.xlu2 %711 }
  0xa9   : > { %v716_v54 = vperm.slane %v712_v20, %v2421_v19 }
  0xab   : > { %v719_v56 = vmul.f32 %v716_v54, %v2384_v8  ;;  %v718_v62 = vmul.f32 %v716_v54, %v2378_v4 }
  0xac   : > { %v500_v23 = vpop.permute.xlu1 %499 }
  0xad   : > { %v474_v21 = vpop.permute.xlu0 %473  ;;  %v504_v25 = vperm.slane %v500_v23, %v2421_v19 }
  0xae   : > { %v478_v22 = vperm.slane %v474_v21, %v2421_v19 }
  0xaf   : > { %v507_v27 = vmul.f32 %v504_v25, %v2384_v8  ;;  %v506_v37 = vmul.f32 %v504_v25, %v2378_v4 }
  0xb0   : > { %v480_v24 = vmul.f32 %v478_v22, %v2378_v4  ;;  %v481_v36 = vmul.f32 %v478_v22, %v2384_v8 }
  0xb1   : > { %v2427_v26 = vpop.permute.xlu2 %629 }
  0xb2   : > { %484 = vrot.lane.b32.xlu2 %v480_v24, %s2181_s21  ;;  %v634_v2 = vperm.slane %v2427_v26, %v2421_v19 }
  0xb4   : > { %v637_v6 = vmul.f32 %v634_v2, %v2384_v8  ;;  %v636_v21 = vmul.f32 %v634_v2, %v2378_v4 }
  0xb5   : > { %v526_v32 = vpop.permute.xlu1 %525 }
  0xb6   : > { %v447_v28 = vpop.permute.xlu0 %446  ;;  %v530_v39 = vperm.slane %v526_v32, %v2421_v19 }
  0xb7   : > { %v451_v29 = vperm.slane %v447_v28, %v2421_v19 }
  0xb8   : > { %v532_v42 = vmul.f32 %v530_v39, %v2378_v4  ;;  %v533_v43 = vmul.f32 %v530_v39, %v2384_v8 }
  0xb9   : > { %v453_v30 = vmul.f32 %v451_v29, %v2378_v4  ;;  %v454_v31 = vmul.f32 %v451_v29, %v2384_v8 }
  0xba   : > { %512 = vrot.lane.b32.xlu2 %v507_v27, %s2182_s25  ;;  %v788_v35 = vpop.permute.xlu2 %787 }
  0xbb   : > { %459 = vrot.lane.b32.xlu1 %v454_v31, %s2183_s19  ;;  %457 = vrot.lane.b32.xlu0 %v453_v30, %s2183_s19  ;;  %v792_v15 = vperm.slane %v788_v35, %v2421_v19  ;;  %s2196_s19 = smov 64  }
  0xbd   : > { %v795_v17 = vmul.f32 %v792_v15, %v2384_v8  ;;  %v794_v18 = vmul.f32 %v792_v15, %v2378_v4 }
  0xbe   : > { %v578_v40 = vpop.permute.xlu1 %577  ;;  %v967_v44 = vpop.permute.xlu0 %966 }
  0xbf   : > { %v582_v46 = vperm.slane %v578_v40, %v2421_v19  ;;  %v971_v22 = vperm.slane %v967_v44, %v2421_v19 }
  0xc1   : > { %v585_v48 = vmul.f32 %v582_v46, %v2384_v8  ;;  %v584_v49 = vmul.f32 %v582_v46, %v2378_v4  ;;  %v974_v24 = vmul.f32 %v971_v22, %v2384_v8  ;;  %v973_v25 = vmul.f32 %v971_v22, %v2378_v4 }
  0xc2   : > { %562 = vrot.lane.b32.xlu2 %v558_v34, %s2184_s30  ;;  %v2445_v45 = vpop.permute.xlu2 %820  ;;  %v654_v34 = vld [vmem:[%s2929_s3] sm:$0xf] }
  0xc3   : > { %510 = vrot.lane.b32.xlu1 %v506_v37, %s2182_s25  ;;  %486 = vrot.lane.b32.xlu0 %v481_v36, %s2181_s21  ;;  %v825_v30 = vrot.slane %v2445_v45, 4 }
  0xc7   : > { %v738_v47 = vpop.permute.xlu1 %737  ;;  %v604_v50 = vpop.permute.xlu0 %603 }
  0xc8   : > { %v608_v53 = vperm.slane %v604_v50, %v2421_v19  ;;  %v742_v59 = vperm.slane %v738_v47, %v2421_v19 }
  0xca   : > { %697 = vrot.lane.b32.xlu2 %v693_v41, %s2181_s21  ;;  %v2452_v52 = vpop.permute.xlu2 %813  ;;  %v610_v55 = vmul.f32 %v608_v53, %v2378_v4  ;;  %v745_v61 = vmul.f32 %v742_v59, %v2384_v8  ;;  %v744_v63 = vmul.f32 %v742_v59, %v2378_v4  ;;  %v611_v7 = vmul.f32 %v608_v53, %v2384_v8 }
  0xcb   : > { %538 = vrot.lane.b32.xlu1 %v533_v43, %s2185_s17  ;;  %536 = vrot.lane.b32.xlu0 %v532_v42, %s2185_s17  ;;  %v835_v38 = vperm.slane %v2452_v52, %v2421_v19 }
  0xcf   : > { %v859_v32 = vpop.permute.xlu0 %858 }
  0xd0   : > { %v763_v57 = vpop.permute.xlu1 %762  ;;  %v864_v41 = vrot.slane %v859_v32, 4 }
  0xd1   : > { %v767_v1 = vperm.slane %v763_v57, %v2421_v19 }
  0xd2   : > { %590 = vrot.lane.b32.xlu2 %v585_v48, %s2186_s22 }
  0xd3   : > { %588 = vrot.lane.b32.xlu1 %v584_v49, %s2186_s22  ;;  %564 = vrot.lane.b32.xlu0 %v559_v51, %s2184_s30  ;;  %v1018_v60 = vpop.permute.xlu2 %1017  ;;  %v769_v3 = vmul.f32 %v767_v1, %v2378_v4  ;;  %v770_v26 = vmul.f32 %v767_v1, %v2384_v8  ;;  %s2206_s30 = smov 16  }
  0xd4   : > { %v1022_v35 = vperm.slane %v1018_v60, %v2421_v19 }
  0xd6   : > { %v1024_v39 = vmul.f32 %v1022_v35, %v2378_v4 }
  0xd7   : > { %v857_v46 = vpop.permute.xlu0 %856 }
  0xd8   : > { %v819_v0 = vpop.permute.xlu1 %818  ;;  %v875_v50 = vperm.slane %v857_v46, %v2421_v19 }
  0xd9   : > { %v824_v31 = vrot.slane %v819_v0, 4 }
  0xda   : > { %614 = vrot.lane.b32.xlu2 %v610_v55, %s2187_s24  ;;  %v1025_v55 = vmul.f32 %v1022_v35, %v2384_v8 }
  0xdb   : > { %724 = vrot.lane.b32.xlu1 %v719_v56, %s2188_s11  ;;  %699 = vrot.lane.b32.xlu0 %v694_v58, %s2181_s21  ;;  %v2474_v5 = vpop.permute.xlu2 %899  ;;  %v826_v37 = vsel %vm463_vm0, %v824_v31, %v825_v30  ;;  %s2195_s21 = smov 24  }
  0xdc   : > { %v828_v40 = vsel %vm827_vm1, %v826_v37, %v2445_v45  ;;  %v904_v51 = vrot.slane %v2474_v5, 4 }
  0xdd   : > { %v837_v47 = vmul.f32 %v835_v38, %v828_v40 }
  0xe0   : > { %v992_v16 = vpop.permute.xlu1 %991  ;;  %v896_v57 = vpop.permute.xlu0 %895 }
  0xe1   : > { %v996_v28 = vperm.slane %v992_v16, %v2421_v19 }
  0xe2   : > { %750 = vrot.lane.b32.xlu2 %v745_v61, %s2186_s22 }
  0xe3   : > { %748 = vrot.lane.b32.xlu1 %v744_v63, %s2186_s22  ;;  %722 = vrot.lane.b32.xlu0 %v718_v62, %s2188_s11  ;;  %v823_v20 = vpop.permute.xlu2 %822  ;;  %v998_v33 = vmul.f32 %v996_v28, %v2378_v4  ;;  %v999_v44 = vmul.f32 %v996_v28, %v2384_v8 }
  0xe4   : > { %v829_v49 = vsel %vm827_vm1, %v825_v30, %v823_v20  ;;  %vm1035_vm1 = vcmask 261120  }
  0xe5   : > { %v838_v54 = vmul.f32 %v835_v38, %v829_v49 }
  0xe8   : > { %v2483_v23 = vpop.permute.xlu1 %860 }
  0xe9   : > { %v865_v42 = vrot.slane %v2483_v23, 4 }
  0xea   : > { %773 = vrot.lane.b32.xlu2 %v769_v3, %s2189_s12 }
  0xeb   : > { %642 = vrot.lane.b32.xlu1 %v637_v6, %s2189_s12  ;;  %616 = vrot.lane.b32.xlu0 %v611_v7, %s2187_s24  ;;  %v2488_v27 = vpop.permute.xlu2 %862  ;;  %v866_v48 = vsel %vm463_vm0, %v864_v41, %v865_v42  ;;  %s2197_s24 = smov 60  }
  0xec   : > { %v868_v52 = vsel %vm867_vm2, %v866_v48, %v2483_v23 }
  0xed   : > { %v877_v56 = vmul.f32 %v875_v50, %v868_v52 }
  0xf0   : > { %v898_v29 = vpop.permute.xlu1 %897 }
  0xf1   : > { %v903_v53 = vrot.slane %v898_v29, 4 }
  0xf2   : > { %800 = vrot.lane.b32.xlu2 %v795_v17, %s2190_s29 }
  0xf3   : > { %798 = vrot.lane.b32.xlu1 %v794_v18, %s2190_s29  ;;  %640 = vrot.lane.b32.xlu0 %v636_v21, %s2189_s12  ;;  %v2500_v36 = vpop.permute.xlu2 %434  ;;  %v905_v59 = vsel %vm463_vm0, %v903_v53, %v904_v51  ;;  %s1669_s29 = scalar_lea.sflag [#allocation4], %s2358_s23 }
  0xf4   : > { %v907_v62 = vsel %vm906_vm3, %v905_v59, %v2474_v5  ;;  %v869_v5 = vsel %vm867_vm2, %v865_v42, %v2488_v27  ;;  %v1797_v27 = vld [vmem:[%s2929_s3 + $0x4] sm:$0xf]  ;;  %v2567_v28 = vperm.slane %v2500_v36, %v2421_v19  ;;  %vm1087_vm2 = vcmask 195584  }
  0xf5   : > { %v878_v15 = vmul.f32 %v875_v50, %v869_v5 }
  0xf8   : > { %v1044_v43 = vpop.permute.xlu1 %1043 }
  0xf9   : > { %v1048_v61 = vperm.slane %v1044_v43, %v2421_v19 }
  0xfa   : > { %979 = vrot.lane.b32.xlu2 %v974_v24, %s2188_s11 }
  0xfb   : > { %977 = vrot.lane.b32.xlu1 %v973_v25, %s2188_s11  ;;  %775 = vrot.lane.b32.xlu0 %v770_v26, %s2189_s12  ;;  %v1050_v0 = vmul.f32 %v1048_v61, %v2378_v4  ;;  %v1051_v1 = vmul.f32 %v1048_v61, %v2384_v8  ;;  %s2198_s11 = smov 56  }
 0x101   : > { %v1070_v58 = vpop.permute.xlu1 %1069 }
 0x102   : > { %1002 = vrot.lane.b32.xlu2 %v998_v33, %s2191_s28  ;;  %v1074_v3 = vperm.slane %v1070_v58, %v2421_v19 }
 0x103   : > { %657 = vperm.xlu1 %1949, %v654_v34   ;;  %954 = vperm.xlu0 %1950, %v2387_v9   ;;  %v441_v34 = vmul.f32 %v2567_v28, %v2378_v4 }
 0x104   : > { %v1077_v7 = vmul.f32 %v1074_v3, %v2384_v8  ;;  %v1076_v16 = vmul.f32 %v1074_v3, %v2378_v4 }
 0x109   : > { %v902_v2 = vpop.permute.xlu1 %901 }
 0x10a   : > { %1028 = vrot.lane.b32.xlu2 %v1024_v39, %s2192_s2  ;;  %v908_v20 = vsel %vm906_vm3, %v904_v51, %v902_v2  ;;  %vm1061_vm3 = vcmask 228352  }
 0x10b   : > { %841 = vrot.lane.b32.xlu1 %v837_v47, %s2193_s6  ;;  %1004 = vrot.lane.b32.xlu0 %v999_v44, %s2191_s28 }
 0x10c   : > { %v2515_v45 = vpop.permute.xlu2 %484  ;;  %1951 = vset.pattern.permute.xlu1 %v2173_v10  ;;  %v914_v10 = vperm.slane %v896_v57, %v2421_v19 }
 0x10d   : > { %v488_v35 = vrot.slane %v2515_v45, 4 }
 0x10e   : > { %v916_v63 = vmul.f32 %v914_v10, %v907_v62  ;;  %v917_v21 = vmul.f32 %v914_v10, %v908_v20 }
 0x111   : > { %v675_v17 = vpop.permute.xlu1 %674 }
 0x112   : > { %843 = vrot.lane.b32.xlu2 %v838_v54, %s2193_s6  ;;  %v679_v47 = vperm.slane %v675_v17, %v2421_v19 }
 0x113   : > { %881 = vrot.lane.b32.xlu1 %v877_v56, %s2193_s6  ;;  %1030 = vrot.lane.b32.xlu0 %v1025_v55, %s2192_s2 }
 0x114   : > { %v2529_v60 = vpop.permute.xlu2 %512  ;;  %v682_v51 = vmul.f32 %v679_v47, %v2384_v8  ;;  %v681_v52 = vmul.f32 %v679_v47, %v2378_v4 }
 0x11a   : > { %920 = vrot.lane.b32.xlu2 %v916_v63, %s2193_s6 }
 0x11b   : > { %1056 = vrot.lane.b32.xlu1 %v1051_v1, %s2194_s15  ;;  %1054 = vrot.lane.b32.xlu0 %v1050_v0, %s2194_s15 }
 0x11c   : > { %v2540_v6 = vpop.permute.xlu2 %562 }
 0x122   : > { %1082 = vrot.lane.b32.xlu2 %v1077_v7, %s2195_s21 }
 0x123   : > { %1080 = vrot.lane.b32.xlu1 %v1076_v16, %s2195_s21  ;;  %883 = vrot.lane.b32.xlu0 %v878_v15, %s2193_s6 }
 0x124   : > { %v2549_v18 = vpop.permute.xlu2 %697 }
 0x12a   : > { %922 = vrot.lane.b32.xlu2 %v917_v21, %s2193_s6 }
 0x12b   : > { %1099 = vrot.lane.b32.xlu1 %v2384_v8, %s2196_s19  ;;  %1097 = vrot.lane.b32.xlu0 %v2378_v4, %s2196_s19 }
 0x12c   : > { %v2557_v22 = vpop.permute.xlu2 %590 }
 0x12d   : > { %v2559_v23 = vpop.permute.xlu1 %459  ;;  %v458_v24 = vpop.permute.xlu0 %457 }
 0x12e   : > { %v462_v25 = vrot.slane %v2559_v23, 4  ;;  %v461_v26 = vrot.slane %v458_v24, 4 }
 0x130   : > { %v464_v29 = vsel %vm463_vm0, %v461_v26, %v462_v25  ;;  %v467_v21 = vsel %vm465_vm4, %v2559_v23, %v462_v25 }
 0x131   : > { %v466_v31 = vsel %vm465_vm4, %v458_v24, %v464_v29  ;;  %v442_v24 = vmul.f32 %v2567_v28, %v2384_v8  ;;  %vm1106_vm4 = vcmask 523264  }
 0x132   : > { %1123 = vrot.lane.b32.xlu2 %v2378_v4, %s2197_s24  ;;  %v470_v37 = vadd.f32 %v466_v31, %v441_v34 }
 0x133   : > { %1095 = vperm.xlu1 %1951, %v2387_v9   ;;  %937 = vperm.xlu0 %1950, %v1797_v27   ;;  %v471_v27 = vadd.f32 %v467_v21, %v442_v24 }
 0x134   : > { %v2575_v30 = vpop.permute.xlu2 %614 }
 0x135   : > { %v2578_v32 = vpop.permute.xlu1 %510  ;;  %v2580_v33 = vpop.permute.xlu0 %486 }
 0x136   : > { %v489_v36 = vrot.slane %v2580_v33, 4  ;;  %v514_v29 = vrot.slane %v2578_v32, 4 }
 0x138   : > { %v490_v38 = vsel %vm463_vm0, %v488_v35, %v489_v36  ;;  %v493_v26 = vsel %vm491_vm5, %v2580_v33, %v489_v36  ;;  %v515_v35 = vrot.slane %v2529_v60, 4  ;;  %v566_v33 = vrot.slane %v2540_v6, 4 }
 0x139   : > { %v492_v39 = vsel %vm491_vm5, %v2515_v45, %v490_v38  ;;  %v701_v45 = vrot.slane %v2549_v18, 4 }
 0x13a   : > { %1149 = vrot.lane.b32.xlu2 %v2378_v4, %s2198_s11  ;;  %v2591_v40 = vadd.f32 %v492_v39, %v470_v37  ;;  %v497_v37 = vadd.f32 %v493_v26, %v471_v27  ;;  %v516_v36 = vsel %vm463_vm0, %v514_v29, %v515_v35 }
 0x13b   : > { %1952 = vset.pattern.permute.xlu1 %v2174_v11  ;;  %1125 = vrot.lane.b32.xlu0 %v2384_v8, %s2197_s24 }
 0x13c   : > { %1121 = vperm.xlu1 %1952, %v2387_v9   ;;  %v751_v41 = vpop.permute.xlu2 %750 }
 0x13d   : > { %v2597_v42 = vpop.permute.xlu1 %538  ;;  %v2599_v43 = vpop.permute.xlu0 %536  ;;  %v753_v53 = vrot.slane %v751_v41, 4 }
 0x13e   : > { %v541_v31 = vrot.slane %v2597_v42, 4  ;;  %v540_v34 = vrot.slane %v2599_v43, 4 }
 0x13f   : > { %v756_v10 = vsel %vm595_vm7, %v751_v41, %v753_v53  ;;  %v519_v41 = vsel %vm517_vm8, %v2529_v60, %v515_v35  ;;  %v618_v60 = vrot.slane %v2575_v30, 4  ;;  %v2693_v35 = vld.sshfl [vmem:[#allocation1 + $0x8] sm:$0xff pattern:$0x75316420] }
 0x140   : > { %v542_v39 = vsel %vm463_vm0, %v540_v34, %v541_v31  ;;  %v545_v47 = vsel %vm543_vm9, %v2597_v42, %v541_v31  ;;  %v2691_v31 = vld.sshfl [vmem:[#allocation1] sm:$0xff pattern:$0x75316420] }
 0x142   : > { %1101 = vrot.lane.b32.xlu2 %v2411_v14, %s2196_s19 }
 0x143   : > { %1151 = vrot.lane.b32.xlu0 %v2384_v8, %s2198_s11 }
 0x144   : > { %1953 = vset.pattern.permute.xlu1 %v2175_v12  ;;  %v2611_v46 = vpop.permute.xlu2 %773  ;;  %v1798_v12 = vld [vmem:[%s2929_s3 + $0x8] sm:$0xf] }
 0x145   : > { %1147 = vperm.xlu1 %1953, %v2387_v9   ;;  %v2607_v11 = vpop.permute.xlu1 %588  ;;  %v2609_v44 = vpop.permute.xlu0 %564 }
 0x146   : > { %v567_v23 = vrot.slane %v2609_v44, 4 }
 0x14a   : > { %1153 = vrot.lane.b32.xlu2 %v2411_v14, %s2198_s11 }
 0x14b   : > { %1127 = vrot.lane.b32.xlu0 %v2411_v14, %s2197_s24 }
 0x14c   : > { %v2625_v14 = vpop.permute.xlu2 %800 }
 0x14d   : > { %1954 = vset.pattern.permute.xlu1 %v2179_v13  ;;  %v725_v9 = vpop.permute.xlu1 %724  ;;  %v700_v48 = vpop.permute.xlu0 %699 }
 0x14e   : > { %v727_v49 = vrot.slane %v725_v9, 4  ;;  %v702_v50 = vrot.slane %v700_v48, 4  ;;  %1176 = vperm.xlu1 %1954, %v1798_v12   ;;  %v523_v12 = vadd.f32 %v519_v41, %v497_v37  ;;  %v2695_v37 = vld.sshfl [vmem:[#allocation1 + $0x10] sm:$0xff pattern:$0x75316420] }
 0x150   : > { %v703_v54 = vsel %vm463_vm0, %v701_v45, %v702_v50  ;;  %v705_v55 = vsel %vm491_vm5, %v700_v48, %v702_v50  ;;  %v731_v57 = vsel %vm729_vm6, %v725_v9, %v727_v49  ;;  %v568_v9 = vsel %vm463_vm0, %v566_v33, %v567_v23 }
 0x151   : > { %v709_v13 = vadd.f32 %v705_v55, %v682_v51  ;;  %v704_v56 = vsel %vm491_vm5, %v2549_v18, %v703_v54  ;;  %v518_v48 = vsel %vm517_vm8, %v2578_v32, %v516_v36  ;;  %v544_v45 = vsel %vm543_vm9, %v2599_v43, %v542_v39 }
 0x152   : > { %v708_v58 = vadd.f32 %v704_v56, %v681_v52  ;;  %v549_v50 = vadd.f32 %v545_v47, %v523_v12  ;;  %v522_v51 = vadd.f32 %v518_v48, %v2591_v40  ;;  %v592_v52 = vrot.slane %v2607_v11, 4 }
 0x153   : > { %v735_v59 = vadd.f32 %v731_v57, %v709_v13  ;;  %v593_v54 = vrot.slane %v2557_v22, 4  ;;  %v570_v42 = vsel %vm569_vm10, %v2540_v6, %v568_v9  ;;  %vm1132_vm5 = vcmask 490496  }
 0x154   : > { %v2639_v15 = vpop.permute.xlu2 %979  ;;  %v548_v55 = vadd.f32 %v544_v45, %v522_v51  ;;  %vm1218_vm8 = vcmask 203776   ;;  %vm1265_vm9 = vcmask 818176  }
 0x155   : > { %v749_v61 = vpop.permute.xlu1 %748  ;;  %v723_v62 = vpop.permute.xlu0 %722  ;;  %v2633_v63 = vadd.f32 %v756_v10, %v735_v59  ;;  %v597_v10 = vsel %vm595_vm7, %v2557_v22, %v593_v54 }
 0x156   : > { %v752_v0 = vrot.slane %v749_v61, 4  ;;  %v726_v1 = vrot.slane %v723_v62, 4  ;;  %v574_v57 = vadd.f32 %v570_v42, %v548_v55 }
 0x158   : > { %v754_v2 = vsel %vm463_vm0, %v752_v0, %v753_v53  ;;  %v728_v3 = vsel %vm463_vm0, %v726_v1, %v727_v49  ;;  %v571_v49 = vsel %vm569_vm10, %v2609_v44, %v567_v23  ;;  %v594_v44 = vsel %vm463_vm0, %v592_v52, %v593_v54  ;;  %v2697_v23 = vld.sshfl [vmem:[#allocation1 + $0x18] sm:$0xff pattern:$0x75316420] }
 0x159   : > { %v755_v5 = vsel %vm595_vm7, %v749_v61, %v754_v2  ;;  %v730_v7 = vsel %vm729_vm6, %v723_v62, %v728_v3  ;;  %v575_v13 = vadd.f32 %v571_v49, %v549_v50  ;;  %v596_v0 = vsel %vm595_vm7, %v2607_v11, %v594_v44 }
 0x15a   : > { %v734_v16 = vadd.f32 %v730_v7, %v708_v58  ;;  %v600_v3 = vadd.f32 %v596_v0, %v574_v57  ;;  %v803_v57 = vrot.slane %v2625_v14, 4  ;;  %vm1323_vm10 = vcmask 130048  }
 0x15b   : > { %v601_v6 = vadd.f32 %v597_v10, %v575_v13 }
 0x15c   : > { %v2641_v17 = vadd.f32 %v755_v5, %v734_v16  ;;  %v2656_v25 = vpop.permute.xlu2 %1002 }
 0x15d   : > { %v643_v18 = vpop.permute.xlu1 %642  ;;  %v617_v20 = vpop.permute.xlu0 %616 }
 0x15e   : > { %v619_v53 = vrot.slane %v617_v20, 4  ;;  %v645_v40 = vrot.slane %v643_v18, 4 }
 0x160   : > { %v620_v58 = vsel %vm463_vm0, %v618_v60, %v619_v53  ;;  %v623_v61 = vsel %vm621_vm11, %v617_v20, %v619_v53  ;;  %v649_v16 = vsel %vm647_vm12, %v643_v18, %v645_v40  ;;  %v777_v60 = vrot.slane %v2611_v46, 4 }
 0x161   : > { %v622_v1 = vsel %vm621_vm11, %v2575_v30, %v620_v58  ;;  %v627_v2 = vadd.f32 %v623_v61, %v601_v6  ;;  %vm1647_vm11 = vcmask 392192  }
 0x162   : > { %v626_v7 = vadd.f32 %v622_v1, %v600_v3 }
 0x163   : > { %v653_v20 = vadd.f32 %v649_v16, %v627_v2 }
 0x164   : > { %v2678_v59 = vpop.permute.xlu2 %1028 }
 0x165   : > { %v2658_v28 = vpop.permute.xlu1 %798  ;;  %v641_v38 = vpop.permute.xlu0 %640 }
 0x166   : > { %v644_v32 = vrot.slane %v641_v38, 4  ;;  %v802_v55 = vrot.slane %v2658_v28, 4 }
 0x168   : > { %v646_v62 = vsel %vm463_vm0, %v644_v32, %v645_v40 }
 0x169   : > { %v648_v5 = vsel %vm647_vm12, %v641_v38, %v646_v62  ;;  %v804_v62 = vsel %vm463_vm0, %v802_v55, %v803_v57 }
 0x16a   : > { %v652_v22 = vadd.f32 %v648_v5, %v626_v7 }
 0x16c   : > { %v844_v27 = vpop.permute.xlu2 %843 }
 0x16d   : > { %v2674_v56 = vpop.permute.xlu1 %977  ;;  %v776_v43 = vpop.permute.xlu0 %775  ;;  %v846_v61 = vrot.slane %v844_v27, 4 }
 0x16e   : > { %v778_v54 = vrot.slane %v776_v43, 4 }
 0x170   : > { %v779_v42 = vsel %vm463_vm0, %v777_v60, %v778_v54  ;;  %v781_v40 = vsel %vm647_vm12, %v776_v43, %v778_v54  ;;  %v807_v43 = vsel %vm805_vm13, %v2625_v14, %v803_v57  ;;  %v1006_v57 = vrot.slane %v2656_v25, 4 }
 0x171   : > { %v780_v58 = vsel %vm647_vm12, %v2611_v46, %v779_v42  ;;  %v785_v0 = vadd.f32 %v781_v40, %v2633_v63  ;;  %v806_v46 = vsel %vm805_vm13, %v2658_v28, %v804_v62  ;;  %v982_v42 = vrot.slane %v2639_v15, 4 }
 0x172   : > { %v784_v1 = vadd.f32 %v780_v58, %v2641_v17  ;;  %vm1651_vm12 = vcmask 785408   ;;  %vm1611_vm13 = vcmask 719872  }
 0x173   : > { %v811_v63 = vadd.f32 %v807_v43, %v785_v0 }
 0x174   : > { %v921_v39 = vpop.permute.xlu2 %920  ;;  %v810_v17 = vadd.f32 %v806_v46, %v784_v1  ;;  %v985_v1 = vsel %vm729_vm6, %v2639_v15, %v982_v42 }
 0x175   : > { %v658_v21 = vpop.permute.xlu1 %657  ;;  %v2688_v24 = vpop.permute.xlu0 %954  ;;  %v924_v14 = vrot.slane %v921_v39, 4 }
 0x176   : > { %v662_v26 = vperm.slane %v658_v21, %v2421_v19 }
 0x178   : > { %v664_v29 = vadd.f32 %v662_v26, %v652_v22  ;;  %v665_v11 = vadd.f32 %v662_v26, %v653_v20 }
 0x17a   : > { %v666_v30 = vmax.f32 %v664_v29, 0.0  ;;  %v667_v34 = vmax.f32 %v665_v11, 0.0 }
 0x17c   : > { %v668_v18 = vmin.f32 %v666_v30, 6.0  ;;  %v669_v38 = vmin.f32 %v667_v34, 6.0  ;;  %v2703_v45 = vpop.permute.xlu2 %1082 }
 0x17d   : > { %v842_v33 = vpop.permute.xlu1 %841  ;;  %v2699_v36 = vpop.permute.xlu0 %1004 }
 0x17e   : > { %1203 = vst [vmem:[#allocation1 + $0x1] ss:$2 sm:$0xff] %v668_v18  ;;  %v845_v44 = vrot.slane %v842_v33, 4  ;;  %v1007_v55 = vrot.slane %v2699_v36, 4 }
 0x17f   : > { %1205 = vst [vmem:[#allocation1 + $0x11] ss:$2 sm:$0xff] %v669_v38  ;;  %v926_v38 = vsel %vm847_vm14, %v924_v14, %v921_v39 }
 0x180   : > { %v849_v2 = vsel %vm463_vm0, %v845_v44, %v846_v61  ;;  %v848_v7 = vsel %vm847_vm14, %v845_v44, %v842_v33  ;;  %v1008_v62 = vsel %vm463_vm0, %v1006_v57, %v1007_v55 }
 0x181   : > { %v850_v16 = vsel %vm847_vm14, %v849_v2, %v844_v27  ;;  %v853_v30 = vadd.f32 %v848_v7, %v810_v17  ;;  %v1032_v2 = vrot.slane %v2678_v59, 4  ;;  %v1011_v17 = vsel %vm1009_vm15, %v2699_v36, %v1007_v55 }
 0x182   : > { %v854_v28 = vadd.f32 %v850_v16, %v811_v63  ;;  %v1010_v63 = vsel %vm1009_vm15, %v2656_v25, %v1008_v62 }
 0x184   : > { %v923_v10 = vpop.permute.xlu2 %922 }
 0x185   : > { %v882_v41 = vpop.permute.xlu1 %881  ;;  %v2701_v47 = vpop.permute.xlu0 %1030  ;;  %v1206_v12 = vld.sshfl [vmem:[#allocation1] sm:$0xff pattern:$0x75316420]  ;;  %v1207_v9 = vld.sshfl [vmem:[#allocation1 + $0x8] sm:$0xff pattern:$0x75316420] }
 0x186   : > { %v1955_v48 = vpack.i.bf16 %v1207_v9, %v1206_v12  ;;  %v1208_v49 = vld.sshfl [vmem:[#allocation1 + $0x10] sm:$0xff pattern:$0x75316420]  ;;  %v1209_v50 = vld.sshfl [vmem:[#allocation1 + $0x18] sm:$0xff pattern:$0x75316420] }
 0x187   : > { %v1975_v53 = vpack.i.bf16 %v1209_v50, %v1208_v49  ;;  %v885_v3 = vrot.slane %v882_v41, 4  ;;  %v925_v20 = vrot.slane %v923_v10, 4  ;;  %v981_v50 = vrot.slane %v2674_v56, 4 }
 0x188   : > { %1956 = vrot.lane.b32.xlu2 %v1955_v48, %s2199_s16 }
 0x189   : > { %v887_v26 = vsel %vm847_vm14, %v885_v3, %v882_v41  ;;  %v927_v34 = vsel %vm463_vm0, %v924_v14, %v925_v20  ;;  %v983_v40 = vsel %vm463_vm0, %v981_v50, %v982_v42 }
 0x18a   : > { %v892_v18 = vadd.f32 %v887_v26, %v853_v30  ;;  %v928_v33 = vsel %vm847_vm14, %v927_v34, %v923_v10  ;;  %v1085_v30 = vrot.slane %v2703_v45, 4 }
 0x18c   : > { %v2732_v29 = vpop.permute.xlu2 %1123  ;;  %v931_v48 = vadd.f32 %v926_v38, %v892_v18 }
 0x18d   : > { %v2705_v51 = vpop.permute.xlu1 %1056  ;;  %v2707_v52 = vpop.permute.xlu0 %1054  ;;  %v1129_v20 = vrot.slane %v2732_v29, 4 }
 0x18e   : > { %v1059_v7 = vrot.slane %v2705_v51, 4  ;;  %v1058_v16 = vrot.slane %v2707_v52, 4 }
 0x190   : > { %1976 = vrot.lane.b32.xlu2 %v1975_v53, %s2199_s16  ;;  %v959_v53 = vperm.slane %v2688_v24, %v2421_v19  ;;  %v1033_v24 = vrot.slane %v2701_v47, 4  ;;  %v1060_v36 = vsel %vm463_vm0, %v1058_v16, %v1059_v7  ;;  %s425_s16 = scalar_select %p424_p1, %s2288_s20, 1 }
 0x192   : > { %v961_v58 = vmul.f32 %v959_v53, %v2378_v4  ;;  %v962_v10 = vmul.f32 %v959_v53, %v2384_v8  ;;  %v1034_v15 = vsel %vm463_vm0, %v1032_v2, %v1033_v24  ;;  %v1037_v29 = vsel %vm1035_vm1, %v2701_v47, %v1033_v24 }
 0x193   : > { %v1036_v18 = vsel %vm1035_vm1, %v2678_v59, %v1034_v15  ;;  %v1063_v47 = vsel %vm1061_vm3, %v2705_v51, %v1059_v7  ;;  %v1062_v59 = vsel %vm1061_vm3, %v2707_v52, %v1060_v36 }
 0x194   : > { %v2744_v39 = vpop.permute.xlu2 %1149  ;;  %v989_v46 = vadd.f32 %v985_v1, %v962_v10 }
 0x195   : > { %v2712_v13 = vpop.permute.xlu1 %1080  ;;  %v884_v32 = vpop.permute.xlu0 %883 }
 0x196   : > { %v886_v6 = vrot.slane %v884_v32, 4 }
 0x198   : > { %v888_v5 = vsel %vm463_vm0, %v885_v3, %v886_v6  ;;  %v984_v3 = vsel %vm729_vm6, %v2674_v56, %v983_v40  ;;  %v1084_v56 = vrot.slane %v2712_v13, 4  ;;  %vm1158_vm6 = vcmask 457728  }
 0x199   : > { %v889_v11 = vsel %vm847_vm14, %v888_v5, %v884_v32  ;;  %v988_v43 = vadd.f32 %v984_v3, %v961_v58 }
 0x19a   : > { %v893_v27 = vadd.f32 %v889_v11, %v854_v28  ;;  %v1015_v28 = vadd.f32 %v1011_v17, %v989_v46 }
 0x19b   : > { %v1014_v25 = vadd.f32 %v1010_v63, %v988_v43 }
 0x19c   : > { %v932_v49 = vadd.f32 %v928_v33, %v893_v27  ;;  %v1102_v34 = vpop.permute.xlu2 %1101  ;;  %v1086_v27 = vsel %vm463_vm0, %v1084_v56, %v1085_v30 }
 0x19d   : > { %v2727_v21 = vpop.permute.xlu1 %1099  ;;  %v2729_v22 = vpop.permute.xlu0 %1097 }
 0x19e   : > { %v1104_v26 = vrot.slane %v2727_v21, 4  ;;  %v1103_v11 = vrot.slane %v2729_v22, 4  ;;  %v1155_v22 = vrot.slane %v2744_v39, 4 }
 0x1a0   : > { %v1105_v38 = vsel %vm463_vm0, %v1103_v11, %v1104_v26  ;;  %v1108_v58 = vsel %vm1106_vm4, %v1104_v26, %v1102_v34 }
 0x1a1   : > { %v1107_v39 = vsel %vm1106_vm4, %v1105_v38, %v2727_v21 }
 0x1a4   : > { %v1154_v21 = vpop.permute.xlu2 %1153 }
 0x1a5   : > { %v1096_v12 = vpop.permute.xlu1 %1095  ;;  %v938_v9 = vpop.permute.xlu0 %937 }
 0x1a6   : > { %v942_v41 = vperm.slane %v938_v9, %v2421_v19  ;;  %v1114_v33 = vperm.slane %v1096_v12, %v2421_v19  ;;  %v1088_v12 = vsel %vm1087_vm2, %v2712_v13, %v1086_v27 }
 0x1a8   : > { %v944_v54 = vadd.f32 %v942_v41, %v931_v48  ;;  %v945_v60 = vadd.f32 %v942_v41, %v932_v49  ;;  %v1116_v57 = vmul.f32 %v1114_v33, %v1107_v39  ;;  %v1117_v24 = vmul.f32 %v1114_v33, %v1108_v58 }
 0x1aa   : > { %v946_v32 = vmax.f32 %v944_v54, 0.0  ;;  %v947_v44 = vmax.f32 %v945_v60, 0.0  ;;  %v1041_v54 = vadd.f32 %v1037_v29, %v1015_v28  ;;  %v1040_v60 = vadd.f32 %v1036_v18, %v1014_v25 }
 0x1ac   : > { %v948_v61 = vmin.f32 %v946_v32, 6.0  ;;  %v949_v6 = vmin.f32 %v947_v44, 6.0  ;;  %v1067_v52 = vadd.f32 %v1063_v47, %v1041_v54  ;;  %v1066_v44 = vadd.f32 %v1062_v59, %v1040_v60 }
 0x1ad   : > { %v2752_v0 = vpop.permute.xlu0 %1125 }
 0x1ae   : > { %1228 = vst [vmem:[#allocation1] ss:$2 sm:$0xff] %v948_v61  ;;  %v1122_v5 = vpop.permute.xlu1 %1121  ;;  %v1130_v14 = vrot.slane %v2752_v0, 4  ;;  %v1092_v13 = vadd.f32 %v1088_v12, %v1066_v44 }
 0x1af   : > { %1230 = vst [vmem:[#allocation1 + $0x10] ss:$2 sm:$0xff] %v949_v6  ;;  %v1140_v42 = vperm.slane %v1122_v5, %v2421_v19 }
 0x1b0   : > { %v1131_v9 = vsel %vm463_vm0, %v1129_v20, %v1130_v14  ;;  %v1118_v2 = vadd.f32 %v1116_v57, %v1092_v13 }
 0x1b1   : > { %v1133_v51 = vsel %vm1132_vm5, %v1131_v9, %v2752_v0  ;;  %v1089_v0 = vsel %vm1087_vm2, %v2703_v45, %v1085_v30 }
 0x1b2   : > { %v1142_v61 = vmul.f32 %v1140_v42, %v1133_v51  ;;  %v1093_v1 = vadd.f32 %v1089_v0, %v1067_v52 }
 0x1b4   : > { %v1119_v16 = vadd.f32 %v1117_v24, %v1093_v1  ;;  %v1144_v63 = vadd.f32 %v1142_v61, %v1118_v2  ;;  %v1545_v2 = vld [vmem:[%s2934_s8] sm:$0xf] }
 0x1b5   : > { %v1152_v48 = vpop.permute.xlu0 %1151  ;;  %v1231_v49 = vld.sshfl [vmem:[#allocation1] sm:$0xff pattern:$0x75316420]  ;;  %v1232_v41 = vld.sshfl [vmem:[#allocation1 + $0x8] sm:$0xff pattern:$0x75316420] }
 0x1b6   : > { %v1156_v50 = vrot.slane %v1152_v48, 4  ;;  %v1960_v53 = vpack.i.bf16 %v1232_v41, %v1231_v49  ;;  %v1233_v6 = vld.sshfl [vmem:[#allocation1 + $0x10] sm:$0xff pattern:$0x75316420] }
 0x1b7   : > { %v1148_v55 = vpop.permute.xlu1 %1147  ;;  %v1234_v62 = vld.sshfl [vmem:[#allocation1 + $0x18] sm:$0xff pattern:$0x75316420] }
 0x1b8   : > { %v1157_v32 = vsel %vm463_vm0, %v1155_v22, %v1156_v50  ;;  %1961 = vrot.lane.b32.xlu0 %v1960_v53, %s2193_s6  ;;  %v1166_v40 = vperm.slane %v1148_v55, %v2421_v19  ;;  %v1160_v43 = vsel %vm1158_vm6, %v1156_v50, %v1154_v21  ;;  %v1965_v7 = vpack.i.bf16 %v1234_v62, %v1233_v6  ;;  %v1281_v53 = vld [vmem:[%s2931_s5] sm:$0xff] }
 0x1b9   : > { %v1159_v10 = vsel %vm1158_vm6, %v1157_v32, %v1152_v48 }
 0x1ba   : > { %v1168_v3 = vmul.f32 %v1166_v40, %v1159_v10  ;;  %v1169_v20 = vmul.f32 %v1166_v40, %v1160_v43 }
 0x1bc   : > { %v1170_v26 = vadd.f32 %v1168_v3, %v1144_v63  ;;  %v1554_v3 = vld [vmem:[%s2935_s9] sm:$0xf] }
 0x1bd   : > { %v1128_v5 = vpop.permute.xlu0 %1127  ;;  %v1406_v63 = vld [vmem:[#allocation7 + $0x60] sm:$0xff] }
 0x1be   : > { %v1134_v46 = vsel %vm1132_vm5, %v1130_v14, %v1128_v5 }
 0x1bf   : > { %v1143_v17 = vmul.f32 %v1140_v42, %v1134_v46  ;;  %v1415_v46 = vld [vmem:[#allocation7 + $0xa8] sm:$0xff] }
 0x1c0   : > { %v1177_v15 = vpop.permute.xlu1 %1176  ;;  %1966 = vrot.lane.b32.xlu0 %v1965_v7, %s2193_s6  ;;  %1429 = vmatpush.msra.mxu3 %v1415_v46  ;;  %v1412_v7 = vld [vmem:[#allocation7 + $0x90] sm:$0xff]  ;;  %s2203_s6 = smov 96  }
 0x1c1   : > { %v1145_v56 = vadd.f32 %v1143_v17, %v1119_v16  ;;  %v1181_v45 = vperm.slane %v1177_v15, %v2421_v19  ;;  %v1409_v16 = vld [vmem:[#allocation7 + $0x78] sm:$0xff]  ;;  %v1403_v17 = vld [vmem:[#allocation7 + $0x48] sm:$0xff]  ;;  %v1400_v15 = vld [vmem:[#allocation7 + $0x30] sm:$0xff] }
 0x1c2   : > { %1430 = vmatpush.msra.mxu3 %v1412_v7 }
 0x1c3   : > { %v1171_v11 = vadd.f32 %v1169_v20, %v1145_v56  ;;  %v1183_v30 = vadd.f32 %v1181_v45, %v1170_v26  ;;  %v1397_v20 = vld [vmem:[#allocation7 + $0x18] sm:$0xff]  ;;  %v1394_v56 = vld [vmem:[#allocation7] sm:$0xff] }
 0x1c4   : > { %1431 = vmatpush.msra.mxu3 %v1409_v16 }
 0x1c5   : > { %v1184_v28 = vadd.f32 %v1181_v45, %v1171_v11  ;;  %v1185_v25 = vmax.f32 %v1183_v30, 0.0 }
 0x1c6   : > { %1432 = vmatpush.msra.mxu3 %v1406_v63 }
 0x1c7   : > { %v1186_v36 = vmax.f32 %v1184_v28, 0.0  ;;  %v1187_v34 = vmin.f32 %v1185_v25, 6.0 }
 0x1c8   : > { %1433 = vmatpush.msra.mxu3 %v1403_v17 }
 0x1c9   : > { %v1188_v29 = vmin.f32 %v1186_v36, 6.0  ;;  %1253 = vst [vmem:[#allocation1 + $0x1] ss:$2 sm:$0xff] %v1187_v34 }
 0x1ca   : > { %1434 = vmatpush.msra.mxu3 %v1400_v15 }
 0x1cb   : > { %1255 = vst [vmem:[#allocation1 + $0x11] ss:$2 sm:$0xff] %v1188_v29 }
 0x1cc   : > { %1435 = vmatpush.msra.mxu3 %v1397_v20 }
 0x1ce   : > { %1436 = vmatpush.msra.mxu3 %v1394_v56 }
 0x1d0   : > { %v1256_v14 = vld.sshfl [vmem:[#allocation1] sm:$0xff pattern:$0x75316420]  ;;  %v1257_v18 = vld.sshfl [vmem:[#allocation1 + $0x8] sm:$0xff pattern:$0x75316420] }
 0x1d1   : > { %v1970_v22 = vpack.i.bf16 %v1257_v18, %v1256_v14  ;;  %1569 = vst [vmem:[#allocation1] ss:$2 sm:$0xff] %v2378_v4 }
 0x1d2   : > { %v1258_v27 = vld.sshfl [vmem:[#allocation1 + $0x10] sm:$0xff pattern:$0x75316420] }
 0x1d3   : > { %1971 = vrot.lane.b32.xlu1 %v1970_v22, %s2200_s18  ;;  %1571 = vst [vmem:[#allocation1 + $0x10] ss:$2 sm:$0xff] %v2384_v8 }
 0x1d8   : > { %v1572_v43 = vld.sshfl [vmem:[#allocation1] sm:$0xff pattern:$0x75316420] }
 0x1da   : > { %v1575_v42 = vld.sshfl [vmem:[#allocation1 + $0x18] sm:$0xff pattern:$0x75316420]  ;;  %v1574_v5 = vld.sshfl [vmem:[#allocation1 + $0x10] sm:$0xff pattern:$0x75316420] }
 0x1db   : > { %1263 = vrot.lane.b32.xlu1 %v1258_v27, %s2200_s18  ;;  %s1796_s18 = sshll.u32 %s425_s16, 3  ;;  %s2201_s16 = smov 112  }
 0x1e2   : > { %v1957_v19 = vpop.permute.xlu2 %1956 }
 0x1e3   : > { %v1959_v38 = vunpack.i.h.bf16 %v1957_v19  ;;  %v1958_v33 = vunpack.i.l.bf16 %v1957_v19  ;;  %v1280_v19 = vld [vmem:[%s2930_s4] sm:$0xff] }
 0x1e5   : > { %v1219_v9 = vsel %vm1218_vm8, %v1958_v33, %v1959_v38  ;;  %v1272_v48 = vsel %vm463_vm0, %v2691_v31, %v1958_v33  ;;  %v1416_v33 = vld [vmem:[#allocation7 + $0xb0] sm:$0xff] }
 0x1e6   : > { %v1273_v49 = vsel %vm463_vm0, %v2693_v35, %v1219_v9  ;;  %v1573_v35 = vld.sshfl [vmem:[#allocation1 + $0x8] sm:$0xff pattern:$0x75316420]  ;;  %v1413_v9 = vld [vmem:[#allocation7 + $0x98] sm:$0xff] }
 0x1e7   : > { %v1980_v41 = vpack.i.bf16 %v1273_v49, %v1272_v48 }
 0x1e9   : > { %1981 = vrot.lane.b32.xlu1 %v1980_v41, %s2194_s15 }
 0x1ea   : > { %v1977_v4 = vpop.permute.xlu2 %1976 }
 0x1eb   : > { %v1979_v47 = vunpack.i.h.bf16 %v1977_v4  ;;  %v1978_v59 = vunpack.i.l.bf16 %v1977_v4  ;;  %v1410_v4 = vld [vmem:[#allocation7 + $0x80] sm:$0xff] }
 0x1ed   : > { %v1220_v50 = vsel %vm1218_vm8, %v1959_v38, %v1978_v59  ;;  %v1221_v8 = vsel %vm1218_vm8, %v1978_v59, %v1979_v47 }
 0x1ee   : > { %v1274_v54 = vsel %vm463_vm0, %v2695_v37, %v1220_v50  ;;  %v1275_v31 = vsel %vm463_vm0, %v2697_v23, %v1221_v8  ;;  %v1407_v50 = vld [vmem:[#allocation7 + $0x68] sm:$0xff]  ;;  %v1417_v8 = vld [vmem:[#allocation7 + $0xb8] sm:$0xff] }
 0x1ef   : > { %v1995_v60 = vpack.i.bf16 %v1275_v31, %v1274_v54  ;;  %v1414_v54 = vld [vmem:[#allocation7 + $0xa0] sm:$0xff]  ;;  %v1401_v31 = vld [vmem:[#allocation7 + $0x38] sm:$0xff] }
 0x1f1   : > { %1284 = vperm.xlu1 %1954, %v1281_v53   ;;  %v1404_v53 = vld [vmem:[#allocation7 + $0x50] sm:$0xff] }
 0x1f9   : > { %1578 = vrot.lane.b32.xlu1 %v1573_v35, %s2194_s15  ;;  %v1398_v35 = vld [vmem:[#allocation7 + $0x20] sm:$0xff] }
 0x201   : > { %1582 = vrot.lane.b32.xlu1 %v1575_v42, %s2194_s15  ;;  %v1408_v42 = vld [vmem:[#allocation7 + $0x70] sm:$0xff] }
 0x22a   : > { %v1962_v55 = vpop.permute.xlu0 %1961 }
 0x22b   : > { %v1964_v12 = vunpack.i.h.bf16 %v1962_v55  ;;  %v1963_v39 = vunpack.i.l.bf16 %v1962_v55  ;;  %v1395_v55 = vld [vmem:[#allocation7 + $0x8] sm:$0xff] }
 0x22d   : > { %v1243_v37 = vsel %vm847_vm14, %v1963_v39, %v1964_v12 }
 0x232   : > { %v1967_v32 = vpop.permute.xlu0 %1966 }
 0x233   : > { %v1969_v40 = vunpack.i.h.bf16 %v1967_v32  ;;  %v1968_v58 = vunpack.i.l.bf16 %v1967_v32  ;;  %v1396_v32 = vld [vmem:[#allocation7 + $0x10] sm:$0xff] }
 0x235   : > { %v1245_v24 = vsel %vm847_vm14, %v1968_v58, %v1969_v40  ;;  %v1244_v21 = vsel %vm847_vm14, %v1964_v12, %v1968_v58  ;;  %v1405_v12 = vld [vmem:[#allocation7 + $0x58] sm:$0xff]  ;;  %v1481_v58 = vld [vmem:[%s2933_s7] sm:$0xf]  ;;  %vm1653_vm14 = vcmask 916480  }
 0x245   : > { %v1972_v51 = vpop.permute.xlu1 %1971 }
 0x246   : > { %v1974_v52 = vunpack.i.h.bf16 %v1972_v51  ;;  %v1973_v44 = vunpack.i.l.bf16 %v1972_v51  ;;  %v1399_v51 = vld [vmem:[#allocation7 + $0x28] sm:$0xff] }
 0x248   : > { %v1266_v23 = vsel %vm1265_vm9, %v1973_v44, %v1974_v52  ;;  %v1276_v57 = vsel %vm463_vm0, %v1963_v39, %v1973_v44  ;;  %v1402_v39 = vld [vmem:[#allocation7 + $0x40] sm:$0xff] }
 0x249   : > { %v1277_v10 = vsel %vm463_vm0, %v1243_v37, %v1266_v23 }
 0x24a   : > { %v1985_v13 = vpack.i.bf16 %v1277_v10, %v1276_v57 }
 0x24c   : > { %1986 = vrot.lane.b32.xlu0 %v1985_v13, %s2194_s15 }
 0x24d   : > { %v1264_v61 = vpop.permute.xlu1 %1263 }
 0x24e   : > { %v1267_v6 = vsel %vm1265_vm9, %v1974_v52, %v1264_v61  ;;  %v1279_v62 = vsel %vm463_vm0, %v1245_v24, %v1264_v61 }
 0x24f   : > { %v1278_v0 = vsel %vm463_vm0, %v1244_v21, %v1267_v6 }
 0x250   : > { %v1990_v1 = vpack.i.bf16 %v1279_v62, %v1278_v0 }
 0x252   : > { %1991 = vrot.lane.b32.xlu2 %v1990_v1, %s2194_s15 }
 0x254   : > { %1996 = vrot.lane.b32.xlu0 %v1995_v60, %s2194_s15  ;;  %v1411_v60 = vld [vmem:[#allocation7 + $0x88] sm:$0xff] }
 0x25a   : > { %1548 = vperm.xlu2 %1948, %v1545_v2  }
 0x25b   : > { %v1982_v25 = vpop.permute.xlu1 %1981 }
 0x25c   : > { %1557 = vperm.xlu0 %1950, %v1554_v3   ;;  %v1984_v34 = vunpack.i.h.bf16 %v1982_v25  ;;  %v1983_v29 = vunpack.i.l.bf16 %v1982_v25 }
 0x25e   : > { %v1311_v38 = vsel %vm1061_vm3, %v1983_v29, %v1984_v34 }
 0x262   : > { %1580 = vrot.lane.b32.xlu2 %v1574_v5, %s2194_s15 }
 0x263   : > { %v1285_v44 = vpop.permute.xlu1 %1284 }
 0x264   : > { %1576 = vrot.lane.b32.xlu0 %v1572_v43, %s2194_s15  ;;  %s427_s15 = scalar_lea.vmem %s2927_s1, %s1796_s18  ;;  %s2202_s18 = smov 88  }
 0x265   : > { %v2843_v26 = vld [vmem:[%s427_s15] sm:$0xff]  ;;  %s2207_s15 = smov 8  }
 0x266   : > { %1802 = vmatmul.msk.f32.vlgmr.msra.gmra.mxu3 %vm1106_vm4, %v2843_v26 }
 0x26b   : > { %v1579_v17 = vpop.permute.xlu1 %1578 }
 0x273   : > { %v1583_v29 = vpop.permute.xlu1 %1582 }
 0x2ac   : > { %v1992_v45 = vpop.permute.xlu2 %1991 }
 0x2ad   : > { %v1994_v11 = vunpack.i.h.bf16 %v1992_v45  ;;  %v1993_v30 = vunpack.i.l.bf16 %v1992_v45 }
 0x2af   : > { %v1316_v28 = vsel %vm1061_vm3, %v1993_v30, %v1994_v11 }
 0x2b0   : > { %1381 = vmatpush.msra.mxu2 %v1316_v28 }
 0x2b4   : > { %v1549_v5 = vpop.permute.xlu2 %1548 }
 0x2bc   : > { %v1581_v25 = vpop.permute.xlu2 %1580 }
 0x2be   : > { %v1987_v36 = vpop.permute.xlu0 %1986 }
 0x2bf   : > { %v1989_v14 = vunpack.i.h.bf16 %v1987_v36  ;;  %v1988_v18 = vunpack.i.l.bf16 %v1987_v36 }
 0x2c1   : > { %v1314_v22 = vsel %vm1061_vm3, %v1988_v18, %v1989_v14  ;;  %v1315_v27 = vsel %vm1061_vm3, %v1989_v14, %v1993_v30  ;;  %v1586_v18 = vsel %vm1061_vm3, %v1581_v25, %v1583_v29 }
 0x2c2   : > { %1341 = vmatpush.msra.mxu0 %v1314_v22  ;;  %1361 = vmatpush.msra.mxu1 %v1315_v27 }
 0x2c4   : > { %1342 = vmatpush.msra.mxu0 %v1311_v38  ;;  %v1585_v38 = vsel %vm1061_vm3, %v1579_v17, %v1581_v25 }
 0x2c5   : > { %1799 = vmatmul.msk.f32.vlgmr.msra.gmra.mxu0 %vm1323_vm10, %v1280_v19 }
 0x2c6   : > { %1449 = vmatpush.msrb.mxu0 %v1416_v33  ;;  %v1997_v48 = vpop.permute.xlu0 %1996 }
 0x2c7   : > { %v1999_v49 = vunpack.i.h.bf16 %v1997_v48  ;;  %v1998_v41 = vunpack.i.l.bf16 %v1997_v48 }
 0x2c8   : > { %1450 = vmatpush.msrb.mxu0 %v1413_v9 }
 0x2c9   : > { %v1312_v47 = vsel %vm1061_vm3, %v1984_v34, %v1998_v41  ;;  %v1313_v59 = vsel %vm1061_vm3, %v1998_v41, %v1999_v49 }
 0x2ca   : > { %1451 = vmatpush.msrb.mxu0 %v1410_v4  ;;  %1362 = vmatpush.msra.mxu1 %v1312_v47 }
 0x2cb   : > { %1382 = vmatpush.msra.mxu2 %v1313_v59  ;;  %1800 = vmatmul.msk.f32.vlgmr.msra.gmra.mxu1 %vm1323_vm10, %v1280_v19 }
 0x2cc   : > { %1801 = vmatmul.msk.f32.vlgmr.msra.gmra.mxu2 %vm1323_vm10, %v1280_v19  ;;  %1452 = vmatpush.msrb.mxu0 %v1407_v50 }
 0x2cd   : > { %1469 = vmatpush.msrb.mxu1 %v1417_v8 }
 0x2ce   : > { %1453 = vmatpush.msrb.mxu0 %v1404_v53  ;;  %v1558_v3 = vpop.permute.xlu0 %1557 }
 0x2cf   : > { %1470 = vmatpush.msrb.mxu1 %v1414_v54 }
 0x2d0   : > { %1454 = vmatpush.msrb.mxu0 %v1401_v31 }
 0x2d1   : > { %1471 = vmatpush.msrb.mxu1 %v1411_v60 }
 0x2d2   : > { %1455 = vmatpush.msrb.mxu0 %v1398_v35 }
 0x2d3   : > { %1472 = vmatpush.msrb.mxu1 %v1408_v42 }
 0x2d4   : > { %1456 = vmatpush.msrb.mxu0 %v1395_v55 }
 0x2d5   : > { %1473 = vmatpush.msrb.mxu1 %v1405_v12  ;;  %1803 = vmatmul.msk.f32.vlgmr.msrb.gmra.mxu0 %vm1106_vm4, %v2843_v26 }
 0x2d6   : > { %v1577_v16 = vpop.permute.xlu0 %1576 }
 0x2d7   : > { %1474 = vmatpush.msrb.mxu1 %v1402_v39  ;;  %v1584_v20 = vsel %vm1061_vm3, %v1577_v16, %v1579_v17 }
 0x2d9   : > { %1475 = vmatpush.msrb.mxu1 %v1399_v51 }
 0x2db   : > { %1476 = vmatpush.msrb.mxu1 %v1396_v32 }
 0x2dc   : > { %1804 = vmatmul.msk.f32.vlgmr.msrb.gmra.mxu1 %vm1106_vm4, %v2843_v26 }
 0x2e9   : > { %v1438_v52 = vpop.f32.mrf.mxu3 }
 0x2ea   : > { %1499 = vmatpush.msrb.mxu2 %v1438_v52 }
 0x342   : > { %v1344_v37 = vpop.f32.mrf.mxu0 }
 0x343   : > { %v1345_v23 = vadd.f32 %v1344_v37, %v1285_v44 }
 0x345   : > { %v1387_v57 = vmax.f32 %v1345_v23, 0.0 }
 0x347   : > { %v1390_v40 = vmin.f32 %v1387_v57, 6.0 }
 0x348   : > { %v1364_v10 = vpop.f32.mrf.mxu1 }
 0x349   : > { %1500 = vmatpush.msrb.mxu2 %v1390_v40  ;;  %v1365_v13 = vadd.f32 %v1364_v10, %v1285_v44 }
 0x34a   : > { %1805 = vmatmul.msk.f32.vlgmr.msrb.gmra.mxu2 %vm1323_vm10, %v1481_v58 }
 0x34b   : > { %v1388_v24 = vmax.f32 %v1365_v13, 0.0 }
 0x34d   : > { %v1391_v62 = vmin.f32 %v1388_v24, 6.0 }
 0x34f   : > { %v1384_v61 = vpop.f32.mrf.mxu2 }
 0x350   : > { %v1385_v21 = vadd.f32 %v1384_v61, %v1285_v44 }
 0x352   : > { %v1458_v6 = vpop.f32.mrf.mxu0  ;;  %v1389_v0 = vmax.f32 %v1385_v21, 0.0 }
 0x353   : > { %1519 = vmatpush.msra.mxu2 %v1458_v6 }
 0x354   : > { %v1392_v2 = vmin.f32 %v1389_v0, 6.0 }
 0x355   : > { %1520 = vmatpush.msra.mxu2 %v1391_v62 }
 0x356   : > { %1806 = vmatmul.msk.f32.vlgmr.msra.gmra.mxu2 %vm1323_vm10, %v1481_v58 }
 0x359   : > { %v1478_v1 = vpop.f32.mrf.mxu1 }
 0x35a   : > { %1539 = vmatpush.msrb.mxu3 %v1478_v1 }
 0x35c   : > { %1540 = vmatpush.msrb.mxu3 %v1392_v2 }
 0x35d   : > { %1807 = vmatmul.msk.f32.vlgmr.msrb.gmra.mxu3 %vm1323_vm10, %v1481_v58 }
 0x3cd   : > { %v1502_v43 = vpop.f32.mrf.mxu2 }
 0x3ce   : > { %v1551_v46 = vmul.f32 %v1549_v5, %v1502_v43 }
 0x3d0   : > { %v1560_v7 = vadd.f32 %v1558_v3, %v1551_v46 }
 0x3d2   : > { %v1563_v63 = vmax.f32 %v1560_v7, 0.0 }
 0x3d4   : > { %v1566_v15 = vmin.f32 %v1563_v63, 6.0 }
 0x3d6   : > { %v1590_v56 = vadd.f32 %v1584_v20, %v1566_v15 }
 0x3d8   : > { %1600 = vrot.lane.b32.xlu0 %v1590_v56, %s2182_s25  ;;  %1597 = vrot.lane.b32.xlu1 %v1590_v56, %s2201_s16  ;;  %s2204_s25 = smov 40  }
 0x3d9   : > { %1594 = vrot.lane.b32.xlu2 %v1590_v56, %s2191_s28  ;;  %v1522_v26 = vpop.f32.mrf.mxu2  ;;  %s2205_s28 = smov 48  }
 0x3da   : > { %v1552_v11 = vmul.f32 %v1549_v5, %v1522_v26 }
 0x3dc   : > { %v1561_v36 = vadd.f32 %v1558_v3, %v1552_v11 }
 0x3de   : > { %v1564_v22 = vmax.f32 %v1561_v36, 0.0 }
 0x3e0   : > { %v1542_v45 = vpop.f32.mrf.mxu3  ;;  %1607 = vrot.lane.b32.xlu0 %v1590_v56, %s2202_s18  ;;  %v1567_v19 = vmin.f32 %v1564_v22, 6.0 }
 0x3e1   : > { %v1553_v30 = vmul.f32 %v1549_v5, %v1542_v45  ;;  %1603 = vrot.lane.b32.xlu2 %v1590_v56, %s2203_s6 }
 0x3e2   : > { %v1591_v33 = vadd.f32 %v1585_v38, %v1567_v19 }
 0x3e3   : > { %v1562_v28 = vadd.f32 %v1558_v3, %v1553_v30 }
 0x3e5   : > { %v1565_v34 = vmax.f32 %v1562_v28, 0.0 }
 0x3e7   : > { %v1568_v14 = vmin.f32 %v1565_v34, 6.0 }
 0x3e9   : > { %v1592_v27 = vadd.f32 %v1586_v18, %v1568_v14 }
 0x3eb   : > { %1630 = vrot.lane.b32.xlu0 %v1592_v27, %s2204_s25  ;;  %1636 = vrot.lane.b32.xlu1 %v1592_v27, %s2195_s21  ;;  %s2208_s21 = smov 72  }
 0x3ec   : > { %1633 = vrot.lane.b32.xlu2 %v1592_v27, %s2192_s2  ;;  %s1813_s2 = sshll.u32 %s2288_s20, 3 }
 0x3ed   : > { %s1680_s17 = scalar_lea.hbm %s2936_s10, %s1813_s2 }
 0x3ee   : > { %s1684_s12 = sshll.u32 %s1680_s17, 4  ;;  %s1685_s12 = int_to_ptr.hbm [resolvable:$true] %s1684_s12 }
 0x3ef   : > { %s2104_s16 = sshra.s32 %s1685_s12, 4  ;;  %s2105_s16 = int_to_ptr.hbm [resolvable:$true] %s2104_s16 }
 0x3f0   : > { %p2111_p7 = scmp.lt.s32.totalorder %s2105_s16, %s2936_s10 }
 0x3f3   : > { %1623 = vrot.lane.b32.xlu0 %v1591_v33, %s2198_s11  ;;  %1626 = vrot.lane.b32.xlu1 %v1591_v33, %s2205_s28  ;;  %s2110_s28 = scalar_lea.hbm %s2936_s10, 16 }
 0x3f4   : > { %1639 = vrot.lane.b32.xlu2 %v1592_v27, %s2206_s30 }
 0x3fb   : > { %1642 = vrot.lane.b32.xlu0 %v1592_v27, %s2207_s15  ;;  %1609 = vrot.lane.b32.xlu1 %v1591_v33, %s2202_s18  ;;  %s2106_s18 = scalar_lea.hbm %s2105_s16, 8 }
 0x3fc   : > { %1620 = vrot.lane.b32.xlu2 %v1591_v33, %s2196_s19  ;;  %p2107_p3 = scmp.ne.s32.totalorder %s2105_s16, %s2106_s18  ;;  %p2112_p8 = scmp.lt.s32.totalorder %s2110_s28, %s2106_s18 }
 0x3fe   : > { %p2108_p5 = pnand %p2107_p3, %p2329_p4  ;;  %p2113_p9 = por %p2112_p8, %p2111_p7 }
 0x400   : > { %p2109_p12 = pneg %p2108_p5 }
 0x402   : > { %p2114_p10 = pnand %p2113_p9, %p2109_p12 }
 0x403   : > { %1614 = vrot.lane.b32.xlu1 %v1591_v33, %s2186_s22  ;;  %s1795_s22 = sshll.u32 %s2358_s23, 3 }
 0x404   : > { %1617 = vrot.lane.b32.xlu2 %v1591_v33, %s2208_s21  ;;  %s423_s20 = scalar_lea.vmem [#allocation8], %s1795_s22 }
 0x405   : > { %s1682_s24 = sshll.u32 %s423_s20, 4  ;;  %s1683_s24 = int_to_ptr.vmem [resolvable:$true] %s1682_s24 }
 0x433   : > { %v1595_v9 = vpop.permute.xlu2 %1594 }
 0x434   : > { %v1645_v12 = vsel %vm1323_vm10, %v1590_v56, %v1595_v9 }
 0x43b   : > { %v1604_v48 = vpop.permute.xlu2 %1603 }
 0x446   : > { %v1634_v41 = vpop.permute.xlu2 %1633 }
 0x44a   : > { %v1601_v49 = vpop.permute.xlu0 %1600  ;;  %v1598_v47 = vpop.permute.xlu1 %1597 }
 0x44b   : > { %v1646_v51 = vsel %vm1035_vm1, %v1645_v12, %v1598_v47 }
 0x44c   : > { %v1648_v44 = vsel %vm1647_vm11, %v1646_v51, %v1601_v49 }
 0x44d   : > { %v1649_v40 = vsel %vm1106_vm4, %v1648_v44, %v1604_v48 }
 0x44e   : > { %v1640_v59 = vpop.permute.xlu2 %1639 }
 0x452   : > { %v1608_v4 = vpop.permute.xlu0 %1607 }
 0x456   : > { %v1621_v53 = vpop.permute.xlu2 %1620 }
 0x45d   : > { %v1631_v50 = vpop.permute.xlu0 %1630  ;;  %v1637_v8 = vpop.permute.xlu1 %1636 }
 0x45e   : > { %v1618_v13 = vpop.permute.xlu2 %1617 }
 0x465   : > { %v1624_v54 = vpop.permute.xlu0 %1623  ;;  %v1627_v31 = vpop.permute.xlu1 %1626 }
 0x466   : > { %v1655_v60 = vsel %vm1323_vm10, %v1621_v53, %v1624_v54 }
 0x467   : > { %v1656_v35 = vsel %vm1035_vm1, %v1655_v60, %v1627_v31 }
 0x468   : > { %v1657_v42 = vsel %vm1647_vm11, %v1656_v35, %v1631_v50 }
 0x469   : > { %v1658_v55 = vsel %vm1106_vm4, %v1657_v42, %v1634_v41 }
 0x46a   : > { %v1659_v32 = vsel %vm595_vm7, %v1658_v55, %v1637_v8 }
 0x46b   : > { %v1660_v37 = vsel %vm1651_vm12, %v1659_v32, %v1640_v59 }
 0x46d   : > { %v1610_v39 = vpop.permute.xlu1 %1609  ;;  %v1643_v52 = vpop.permute.xlu0 %1642 }
 0x46e   : > { %v1612_v23 = vsel %vm1611_vm13, %v1608_v4, %v1610_v39  ;;  %v1661_v57 = vsel %vm1653_vm14, %v1660_v37, %v1643_v52 }
 0x46f   : > { %v1650_v10 = vsel %vm595_vm7, %v1649_v40, %v1612_v23  ;;  %v1664_v24 = vrot.slane %v1661_v57, 4 }
 0x475   : > { %v1615_v58 = vpop.permute.xlu1 %1614 }
 0x476   : > { %v1652_v61 = vsel %vm1651_vm12, %v1650_v10, %v1615_v58 }
 0x477   : > { %v1654_v21 = vsel %vm1653_vm14, %v1652_v61, %v1618_v13 }
 0x478   : > { %v1665_v6 = vsel %vm463_vm0, %v1654_v21, %v1664_v24 }
 0x479   : > { %1667 = vst [vmem:[%s423_s20] sm:$0xff] %v1665_v6 }
 0x47a   : > { %2117 = shalt.err (!%p2114_p10)
}
 0x47b   : > { %1827 = dma.vmem_to_hbm [thread:$0]  (%p2329_p4), %s1683_s24, 128, %s1685_s12, %s1669_s29  }
 0x47c PF: > { %s2954_s23 = sld [smem:[#allocation13_spill]]  ;;  %s1696_s21 = sand.u32 1, %s2148_s13  }
 0x47d   : > { %s1697_s22 = scalar_lea.sflag [#allocation4], %s1696_s21 }
 0x482   : > { %p2955_p11 = scmp.ge.s32.totalorder %s2954_s23, 2 }
 0x484   : > { %p1841_p13 = pnand %p2955_p11, %p2333_p6 }
 0x486   : > { %p1842_p0 = pneg %p1841_p13 }
 0x488   : > { %2143 = dma.done.wait (%p1842_p0), %s1697_s22, 128  }
 0x489   : > { %2145 = vsyncadd (%p1842_p0), %s1697_s22, 4294967168  ;;  %s2956_s16 = sld [smem:[#allocation14_spill]]  ;;  %s2959_s13 = smov %s2152_s14 }
 0x48a   : > { %s2957_s2 = sld [smem:[#allocation12_spill]] }
 0x48b   : > { %s2958_s15 = sld [smem:[#allocation15_spill]] }
 0x48f   : > { %p24_p2 = scmp.ge.s32.totalorder %s2956_s16, 4  }
 0x490   : > { %s2960_s14 = smov %s2957_s2 }
 0x491   :  { %26 = sbr.rel (!%p24_p2) target bundleno = 9 (0x9), region = 127 }
 0x496   :  { %1703 = vsyncpa [#allocation3], 1 }
 0x497   :  { %1705 = vsyncpa [#allocation3 + $0x1], 1 }
 0x498   :  { %1706 = vsyncpa [#allocation6], 1 }
 0x499   :  { %1707 = vsyncpa [#allocation4], 1 }
 0x49a   :  { %1709 = vsyncpa [#allocation4 + $0x1], 1 }

</bundles_post_ra>
